<compile_context>
chip_gen: v7x
topology: tpu7x:2x2x1
jax: 0.10.0
libtpu: 0.0.40
codegen_flags: <defaults>
</compile_context>

<pallas_src>
import functools

import jax
import jax.numpy as jnp
from jax.experimental import pallas as pl
from jax.experimental.pallas import tpu as pltpu


# ---------------------------------------------------------------------------
# helpers
# ---------------------------------------------------------------------------
def _pick_tile(s: int, target: int = 2048) -> int:
    """Largest divisor of s that is <= target (spatial tile on the lane axis)."""
    if s <= target:
        return s
    for t in range(target, 0, -1):
        if s % t == 0:
            return t
    return s


def _gelu(x):
    return jax.nn.gelu(x, approximate=True)


def _channel_mac(xg, w_ref, b_ref):
    """1x1 conv over channels in the (C, spatial) layout.

    xg: (Cin, ts) f32, w_ref: (Cout, Cin), b_ref: (Cout, 1) -> (Cout, ts) f32.
    Small channel counts use an unrolled VPU broadcast-MAC (K=Cin would waste
    the MXU); large channel counts fall back to a real MXU matmul.
    """
    cout, cin = w_ref.shape
    w = w_ref[...].astype(jnp.float32)
    b = b_ref[...].astype(jnp.float32)
    if cin >= 128:
        acc = jnp.dot(w, xg, preferred_element_type=jnp.float32)
    else:
        acc = jnp.zeros((cout, xg.shape[1]), jnp.float32)
        for i in range(cin):  # static unroll, tiny Cin
            acc = acc + w[:, i:i + 1] * xg[i:i + 1, :]
    return acc + b


# ---------------------------------------------------------------------------
# Kernel 1: fused  h = gelu(x)  and  y2 = conv1(h)   (both emitted)
# ---------------------------------------------------------------------------
def _act_pw_kernel(x_ref, w_ref, b_ref, h_ref, y_ref):
    xg = _gelu(x_ref[0].astype(jnp.float32))          # (Cin, ts)
    h_ref[0] = xg.astype(h_ref.dtype)
    y_ref[0] = _channel_mac(xg, w_ref, b_ref).astype(y_ref.dtype)


def _fused_act_pointwise(x3, w, b):
    n, cin, s = x3.shape
    cout = w.shape[0]
    ts = _pick_tile(s)
    grid = (n, s // ts)
    return pl.pallas_call(
        _act_pw_kernel,
        out_shape=(jax.ShapeDtypeStruct((n, cin, s), x3.dtype),
                   jax.ShapeDtypeStruct((n, cout, s), x3.dtype)),
        grid_spec=pltpu.PrefetchScalarGridSpec(
            num_scalar_prefetch=0,
            grid=grid,
            in_specs=[
                pl.BlockSpec((1, cin, ts), lambda i, j: (i, 0, j)),
                pl.BlockSpec((cout, cin), lambda i, j: (0, 0)),
                pl.BlockSpec((cout, 1), lambda i, j: (0, 0)),
            ],
            out_specs=[
                pl.BlockSpec((1, cin, ts), lambda i, j: (i, 0, j)),
                pl.BlockSpec((1, cout, ts), lambda i, j: (i, 0, j)),
            ]),
        compiler_params=pltpu.CompilerParams(
            dimension_semantics=("parallel", "parallel")),
    )(x3, w, b.reshape(cout, 1))


# ---------------------------------------------------------------------------
# Kernel 2: fused  g = gelu(x1 + y2)  and  z2 = conv2(g)
# ---------------------------------------------------------------------------
def _add_act_pw_kernel(a_ref, b_in_ref, w_ref, bias_ref, g_ref, z_ref):
    s = a_ref[0].astype(jnp.float32) + b_in_ref[0].astype(jnp.float32)
    g = _gelu(s)
    g_ref[0] = g.astype(g_ref.dtype)
    z_ref[0] = _channel_mac(g, w_ref, bias_ref).astype(z_ref.dtype)


def _fused_add_act_pointwise(a3, b3, w, bias):
    n, c, s = a3.shape
    cout = w.shape[0]
    ts = _pick_tile(s)
    grid = (n, s // ts)
    return pl.pallas_call(
        _add_act_pw_kernel,
        out_shape=(jax.ShapeDtypeStruct((n, c, s), a3.dtype),
                   jax.ShapeDtypeStruct((n, cout, s), a3.dtype)),
        grid_spec=pltpu.PrefetchScalarGridSpec(
            num_scalar_prefetch=0,
            grid=grid,
            in_specs=[
                pl.BlockSpec((1, c, ts), lambda i, j: (i, 0, j)),
                pl.BlockSpec((1, c, ts), lambda i, j: (i, 0, j)),
                pl.BlockSpec((cout, c), lambda i, j: (0, 0)),
                pl.BlockSpec((cout, 1), lambda i, j: (0, 0)),
            ],
            out_specs=[
                pl.BlockSpec((1, c, ts), lambda i, j: (i, 0, j)),
                pl.BlockSpec((1, cout, ts), lambda i, j: (i, 0, j)),
            ]),
        compiler_params=pltpu.CompilerParams(
            dimension_semantics=("parallel", "parallel")),
    )(a3, b3, w, bias.reshape(cout, 1))


# ---------------------------------------------------------------------------
# Kernel 3: fused final  out = x1b + z2 + shortcut(x)
# ---------------------------------------------------------------------------
def _final_conv_sc_kernel(x1_ref, z2_ref, x_ref, wsc_ref, bsc_ref, o_ref):
    acc = x1_ref[0].astype(jnp.float32) + z2_ref[0].astype(jnp.float32)
    acc = acc + _channel_mac(x_ref[0].astype(jnp.float32), wsc_ref, bsc_ref)
    o_ref[0] = acc.astype(o_ref.dtype)


def _final_id_sc_kernel(x1_ref, z2_ref, x_ref, o_ref):
    acc = (x1_ref[0].astype(jnp.float32) + z2_ref[0].astype(jnp.float32)
           + x_ref[0].astype(jnp.float32))
    o_ref[0] = acc.astype(o_ref.dtype)


def _fused_final(x1b3, z23, x3, wsc, bsc, conv_shortcut):
    n, cout, s = x1b3.shape
    cin = x3.shape[1]
    ts = _pick_tile(s)
    grid = (n, s // ts)
    if conv_shortcut:
        kernel = _final_conv_sc_kernel
        in_specs = [
            pl.BlockSpec((1, cout, ts), lambda i, j: (i, 0, j)),
            pl.BlockSpec((1, cout, ts), lambda i, j: (i, 0, j)),
            pl.BlockSpec((1, cin, ts), lambda i, j: (i, 0, j)),
            pl.BlockSpec((cout, cin), lambda i, j: (0, 0)),
            pl.BlockSpec((cout, 1), lambda i, j: (0, 0)),
        ]
        args = (x1b3, z23, x3, wsc, bsc.reshape(cout, 1))
    else:
        kernel = _final_id_sc_kernel
        in_specs = [
            pl.BlockSpec((1, cout, ts), lambda i, j: (i, 0, j)),
            pl.BlockSpec((1, cout, ts), lambda i, j: (i, 0, j)),
            pl.BlockSpec((1, cin, ts), lambda i, j: (i, 0, j)),
        ]
        args = (x1b3, z23, x3)
    return pl.pallas_call(
        kernel,
        out_shape=jax.ShapeDtypeStruct((n, cout, s), x1b3.dtype),
        grid_spec=pltpu.PrefetchScalarGridSpec(
            num_scalar_prefetch=0,
            grid=grid,
            in_specs=in_specs,
            out_specs=pl.BlockSpec((1, cout, ts), lambda i, j: (i, 0, j))),
        compiler_params=pltpu.CompilerParams(
            dimension_semantics=("parallel", "parallel")),
    )(*args)


# ---------------------------------------------------------------------------
# Kernel 4: spectral conv mode mixing (complex, per-mode channel contraction)
#   out[b,o,f] = sum_i x[b,i,f] * w[i,o,f]      (complex), f = flattened modes
# ---------------------------------------------------------------------------
def _mode_mix_kernel(xr_ref, xi_ref, wr_ref, wi_ref, or_ref, oi_ref):
    cin = xr_ref.shape[1]
    cout = or_ref.shape[1]
    f = xr_ref.shape[2]
    xr = xr_ref[0].astype(jnp.float32)           # (Cin, F)
    xi = xi_ref[0].astype(jnp.float32)
    accr = jnp.zeros((cout, f), jnp.float32)
    acci = jnp.zeros((cout, f), jnp.float32)
    for i in range(cin):                          # static unroll, tiny Cin
        wr_i = wr_ref[i].astype(jnp.float32)      # (Cout, F)
        wi_i = wi_ref[i].astype(jnp.float32)
        xr_i = xr[i:i + 1, :]                     # (1, F)
        xi_i = xi[i:i + 1, :]
        accr = accr + xr_i * wr_i - xi_i * wi_i
        acci = acci + xr_i * wi_i + xi_i * wr_i
    or_ref[0] = accr.astype(or_ref.dtype)
    oi_ref[0] = acci.astype(oi_ref.dtype)


def _spectral_conv(v, wr1, wi1, wr2, wi2, m1, m2, cout):
    """FNO spectral conv. v: (N, C, H, W) f32 -> (N, Cout, H, W) f32.

    The FFTs run in XLA (no Pallas FFT); the per-mode complex channel mixing is
    a Pallas kernel over the (tiny) retained-mode tensor.
    """
    n, c, h, w = v.shape
    wf = w // 2 + 1
    vf = jnp.fft.rfft2(v, axes=(-2, -1))                         # (N, C, H, Wf) c64
    pos = vf[:, :, :m1, :m2]
    neg = vf[:, :, h - m1:, :m2]
    xm = jnp.concatenate([pos, neg], axis=2)                     # (N, C, 2*m1, m2)
    f = 2 * m1 * m2
    xr = jnp.real(xm).reshape(n, c, f).astype(jnp.float32)
    xi = jnp.imag(xm).reshape(n, c, f).astype(jnp.float32)
    wr = jnp.concatenate([wr1, wr2], axis=2).reshape(c, cout, f)
    wi = jnp.concatenate([wi1, wi2], axis=2).reshape(c, cout, f)

    or_, oi = pl.pallas_call(
        _mode_mix_kernel,
        out_shape=(jax.ShapeDtypeStruct((n, cout, f), jnp.float32),
                   jax.ShapeDtypeStruct((n, cout, f), jnp.float32)),
        grid_spec=pltpu.PrefetchScalarGridSpec(
            num_scalar_prefetch=0,
            grid=(n,),
            in_specs=[
                pl.BlockSpec((1, c, f), lambda i: (i, 0, 0)),
                pl.BlockSpec((1, c, f), lambda i: (i, 0, 0)),
                pl.BlockSpec((c, cout, f), lambda i: (0, 0, 0)),
                pl.BlockSpec((c, cout, f), lambda i: (0, 0, 0)),
            ],
            out_specs=[
                pl.BlockSpec((1, cout, f), lambda i: (i, 0, 0)),
                pl.BlockSpec((1, cout, f), lambda i: (i, 0, 0)),
            ]),
        compiler_params=pltpu.CompilerParams(
            dimension_semantics=("parallel",)),
    )(xr, xi, wr, wi)

    om = jax.lax.complex(or_, oi).reshape(n, cout, 2 * m1, m2)
    out_ft = jnp.zeros((n, cout, h, wf), jnp.complex64)
    out_ft = out_ft.at[:, :, :m1, :m2].set(om[:, :, :m1])
    out_ft = out_ft.at[:, :, h - m1:, :m2].set(om[:, :, m1:])
    return jnp.fft.irfft2(out_ft, s=(h, w), axes=(-2, -1))


# ---------------------------------------------------------------------------
# FourierDownBlock forward (has_attn=False, norm=False defaults)
# ---------------------------------------------------------------------------
def fourier_down_block_forward(params, x, *, modes1, modes2):
    """x: (N, Cin, H, W) f32 -> (N, Cout, H, W) f32 (NCHW throughout)."""
    n, cin, h, w = x.shape
    cout = params["w1"].shape[0]
    s = h * w
    x3 = x.reshape(n, cin, s)

    # Stage 1: fused gelu + conv1 (also emits h for the FFT path).
    h3, y2 = _fused_act_pointwise(x3, params["w1"], params["b1"])
    x1 = _spectral_conv(h3.reshape(n, cin, h, w),
                        params["f1_wr1"], params["f1_wi1"],
                        params["f1_wr2"], params["f1_wi2"], modes1, modes2, cout)

    # Stage 2: fused (x1 + y2) -> gelu -> conv2 (also emits g for the FFT path).
    g3, z2 = _fused_add_act_pointwise(x1.reshape(n, cout, s), y2,
                                      params["w2"], params["b2"])
    x1b = _spectral_conv(g3.reshape(n, cout, h, w),
                         params["f2_wr1"], params["f2_wi1"],
                         params["f2_wr2"], params["f2_wi2"], modes1, modes2, cout)

    # Stage 3: fused x1b + z2 + shortcut(x).
    out3 = _fused_final(x1b.reshape(n, cout, s), z2, x3,
                        params["wsc"], params["bsc"],
                        conv_shortcut=(cin != cout))

    # has_attn defaults to False -> self.attn = nn.Identity().
    # TODO(synk): AttentionBlock (has_attn=True) path not implemented as a Pallas kernel.
    return out3.reshape(n, cout, h, w)


# ---------------------------------------------------------------------------
# Parameter init (matches the PyTorch module's parameter shapes/semantics)
# ---------------------------------------------------------------------------
def init_params(key, cin, cout, m1, m2):
    ks = jax.random.split(key, 8)

    def conv1x1(kw, kb, co, ci):
        bound = 1.0 / (ci ** 0.5)
        wgt = jax.random.uniform(kw, (co, ci), jnp.float32, -bound, bound)
        bia = jax.random.uniform(kb, (co,), jnp.float32, -bound, bound)
        return wgt, bia

    def fno(k, ci, co):
        scale = 1.0 / (ci * co)
        kk = jax.random.split(k, 4)
        return (scale * jax.random.uniform(kk[0], (ci, co, m1, m2), jnp.float32),
                scale * jax.random.uniform(kk[1], (ci, co, m1, m2), jnp.float32),
                scale * jax.random.uniform(kk[2], (ci, co, m1, m2), jnp.float32),
                scale * jax.random.uniform(kk[3], (ci, co, m1, m2), jnp.float32))

    w1, b1 = conv1x1(ks[0], ks[1], cout, cin)
    w2, b2 = conv1x1(ks[2], ks[3], cout, cout)
    wsc, bsc = conv1x1(ks[4], ks[5], cout, cin)
    f1_wr1, f1_wi1, f1_wr2, f1_wi2 = fno(ks[6], cin, cout)
    f2_wr1, f2_wi1, f2_wr2, f2_wi2 = fno(ks[7], cout, cout)
    return dict(w1=w1, b1=b1, w2=w2, b2=b2, wsc=wsc, bsc=bsc,
                f1_wr1=f1_wr1, f1_wi1=f1_wi1, f1_wr2=f1_wr2, f1_wi2=f1_wi2,
                f2_wr1=f2_wr1, f2_wi1=f2_wi1, f2_wr2=f2_wr2, f2_wi2=f2_wi2)


# ---------------------------------------------------------------------------
# Pure-JAX reference for correctness checking.
# ---------------------------------------------------------------------------
def _reference(params, x, modes1, modes2):
    hi = jax.lax.Precision.HIGHEST

    def pw(v, wgt, bia):
        return (jnp.einsum("oi,nihw->nohw", wgt, v, precision=hi)
                + bia[None, :, None, None])

    def cmul(vf_block, wr, wi):
        vr, vi = jnp.real(vf_block), jnp.imag(vf_block)
        orr = (jnp.einsum("nixy,ioxy->noxy", vr, wr, precision=hi)
               - jnp.einsum("nixy,ioxy->noxy", vi, wi, precision=hi))
        oii = (jnp.einsum("nixy,ioxy->noxy", vr, wi, precision=hi)
               + jnp.einsum("nixy,ioxy->noxy", vi, wr, precision=hi))
        return jax.lax.complex(orr, oii)

    def spec(v, wr1, wi1, wr2, wi2):
        n, c, hh, ww = v.shape
        co = wr1.shape[1]
        wf = ww // 2 + 1
        vf = jnp.fft.rfft2(v, axes=(-2, -1))
        out_ft = jnp.zeros((n, co, hh, wf), jnp.complex64)
        out_ft = out_ft.at[:, :, :modes1, :modes2].set(
            cmul(vf[:, :, :modes1, :modes2], wr1, wi1))
        out_ft = out_ft.at[:, :, hh - modes1:, :modes2].set(
            cmul(vf[:, :, hh - modes1:, :modes2], wr2, wi2))
        return jnp.fft.irfft2(out_ft, s=(hh, ww), axes=(-2, -1))

    h = _gelu(x)
    x1 = spec(h, params["f1_wr1"], params["f1_wi1"], params["f1_wr2"], params["f1_wi2"])
    x2 = pw(h, params["w1"], params["b1"])
    out = _gelu(x1 + x2)
    x1b = spec(out, params["f2_wr1"], params["f2_wi1"], params["f2_wr2"], params["f2_wi2"])
    x2b = pw(out, params["w2"], params["b2"])
    if x.shape[1] != params["w1"].shape[0]:
        sc = pw(x, params["wsc"], params["bsc"])
    else:
        sc = x
    return x1b + x2b + sc


if __name__ == "__main__":
    key = jax.random.PRNGKey(0)
    k_x, k_p = jax.random.split(key)

    N, Cin, H, W = 2, 4, 16, 16
    Cout = 8
    modes1 = modes2 = 4

    x = jax.random.normal(k_x, (N, Cin, H, W), jnp.float32)
    params = init_params(k_p, Cin, Cout, modes1, modes2)

    fwd = jax.jit(lambda p, xx: fourier_down_block_forward(
        p, xx, modes1=modes1, modes2=modes2))
    out = jax.block_until_ready(fwd(params, x))
    ref = jax.block_until_ready(_reference(params, x, modes1, modes2))

    assert out.shape == (N, Cout, H, W), out.shape
    max_err = float(jnp.max(jnp.abs(out - ref)))
    assert jnp.allclose(out, ref, atol=1e-3, rtol=1e-3), max_err

    print("KERNEL_OK")
</pallas_src>

<mosaic_0001>
module attributes {stable_mosaic.version = 11 : i64} {
  func.func @_act_pw_kernel(%arg0: i32, %arg1: i32, %arg2: memref<1x4x256xf32, #tpu.memory_space<vmem>>, %arg3: memref<8x4xf32, #tpu.memory_space<vmem>>, %arg4: memref<8x1xf32, #tpu.memory_space<vmem>>, %arg5: memref<1x4x256xf32, #tpu.memory_space<vmem>>, %arg6: memref<1x8x256xf32, #tpu.memory_space<vmem>>) attributes {dimension_semantics = [#tpu.dimension_semantics<parallel>, #tpu.dimension_semantics<parallel>], iteration_bounds = array<i64: 2, 1>, scalar_prefetch = 0 : i64, scratch_operands = 0 : i64, tpu.core_type = #tpu.core_type<tc>, window_params = [{transform_indices = @transform_0, window_bounds = array<i64: 1, 4, 256>}, {pipeline_mode = #tpu.pipeline_mode<synchronous>, transform_indices = @transform_1, window_bounds = array<i64: 8, 4>}, {pipeline_mode = #tpu.pipeline_mode<synchronous>, transform_indices = @transform_2, window_bounds = array<i64: 8, 1>}, {transform_indices = @transform_3, window_bounds = array<i64: 1, 4, 256>}, {transform_indices = @transform_4, window_bounds = array<i64: 1, 8, 256>}]} {
    %c0 = arith.constant 0 : index
    %c0_0 = arith.constant 0 : index
    %c0_1 = arith.constant 0 : index
    %0 = vector.load %arg2[%c0, %c0_0, %c0_1] : memref<1x4x256xf32, #tpu.memory_space<vmem>>, vector<1x4x256xf32>
    %1 = vector.shape_cast %0 : vector<1x4x256xf32> to vector<4x256xf32>
    %2 = arith.mulf %1, %1 : vector<4x256xf32>
    %3 = arith.mulf %1, %2 : vector<4x256xf32>
    %cst = arith.constant 4.471500e-02 : f32
    %4 = vector.broadcast %cst : f32 to vector<4x256xf32>
    %5 = arith.mulf %4, %3 : vector<4x256xf32>
    %6 = arith.addf %1, %5 : vector<4x256xf32>
    %cst_2 = arith.constant 0.797884583 : f32
    %7 = vector.broadcast %cst_2 : f32 to vector<4x256xf32>
    %8 = arith.mulf %7, %6 : vector<4x256xf32>
    %9 = math.tanh %8 : vector<4x256xf32>
    %cst_3 = arith.constant 1.000000e+00 : f32
    %10 = vector.broadcast %cst_3 : f32 to vector<4x256xf32>
    %11 = arith.addf %10, %9 : vector<4x256xf32>
    %cst_4 = arith.constant 5.000000e-01 : f32
    %12 = vector.broadcast %cst_4 : f32 to vector<4x256xf32>
    %13 = arith.mulf %12, %11 : vector<4x256xf32>
    %14 = arith.mulf %1, %13 : vector<4x256xf32>
    %c0_5 = arith.constant 0 : index
    %c0_6 = arith.constant 0 : index
    %c0_7 = arith.constant 0 : index
    %15 = vector.load %arg5[%c0_5, %c0_6, %c0_7] : memref<1x4x256xf32, #tpu.memory_space<vmem>>, vector<1x4x256xf32>
    %16 = vector.shape_cast %15 : vector<1x4x256xf32> to vector<4x256xf32>
    %17 = vector.shape_cast %14 : vector<4x256xf32> to vector<1x4x256xf32>
    tpu.vector_store %arg5[%c0_5, %c0_6, %c0_7], %17 {strides = array<i32>} : memref<1x4x256xf32, #tpu.memory_space<vmem>>, vector<1x4x256xf32>,
    %c0_8 = arith.constant 0 : index
    %c0_9 = arith.constant 0 : index
    %18 = vector.load %arg3[%c0_8, %c0_9] : memref<8x4xf32, #tpu.memory_space<vmem>>, vector<8x4xf32>
    %c0_10 = arith.constant 0 : index
    %c0_11 = arith.constant 0 : index
    %19 = vector.load %arg4[%c0_10, %c0_11] : memref<8x1xf32, #tpu.memory_space<vmem>>, vector<8x1xf32>
    %cst_12 = arith.constant 0.000000e+00 : f32
    %20 = vector.broadcast %cst_12 : f32 to vector<8x256xf32>
    %21 = vector.extract_strided_slice %18 {offsets = [0, 0], sizes = [8, 1], strides = [1, 1]} : vector<8x4xf32> to vector<8x1xf32>
    %22 = vector.extract_strided_slice %14 {offsets = [0, 0], sizes = [1, 256], strides = [1, 1]} : vector<4x256xf32> to vector<1x256xf32>
    %23 = vector.broadcast %21 : vector<8x1xf32> to vector<8x256xf32>
    %24 = vector.broadcast %22 : vector<1x256xf32> to vector<8x256xf32>
    %25 = arith.mulf %23, %24 : vector<8x256xf32>
    %26 = arith.addf %20, %25 : vector<8x256xf32>
    %27 = vector.extract_strided_slice %18 {offsets = [0, 1], sizes = [8, 1], strides = [1, 1]} : vector<8x4xf32> to vector<8x1xf32>
    %28 = vector.extract_strided_slice %14 {offsets = [1, 0], sizes = [1, 256], strides = [1, 1]} : vector<4x256xf32> to vector<1x256xf32>
    %29 = vector.broadcast %27 : vector<8x1xf32> to vector<8x256xf32>
    %30 = vector.broadcast %28 : vector<1x256xf32> to vector<8x256xf32>
    %31 = arith.mulf %29, %30 : vector<8x256xf32>
    %32 = arith.addf %26, %31 : vector<8x256xf32>
    %33 = vector.extract_strided_slice %18 {offsets = [0, 2], sizes = [8, 1], strides = [1, 1]} : vector<8x4xf32> to vector<8x1xf32>
    %34 = vector.extract_strided_slice %14 {offsets = [2, 0], sizes = [1, 256], strides = [1, 1]} : vector<4x256xf32> to vector<1x256xf32>
    %35 = vector.broadcast %33 : vector<8x1xf32> to vector<8x256xf32>
    %36 = vector.broadcast %34 : vector<1x256xf32> to vector<8x256xf32>
    %37 = arith.mulf %35, %36 : vector<8x256xf32>
    %38 = arith.addf %32, %37 : vector<8x256xf32>
    %39 = vector.extract_strided_slice %18 {offsets = [0, 3], sizes = [8, 1], strides = [1, 1]} : vector<8x4xf32> to vector<8x1xf32>
    %40 = vector.extract_strided_slice %14 {offsets = [3, 0], sizes = [1, 256], strides = [1, 1]} : vector<4x256xf32> to vector<1x256xf32>
    %41 = vector.broadcast %39 : vector<8x1xf32> to vector<8x256xf32>
    %42 = vector.broadcast %40 : vector<1x256xf32> to vector<8x256xf32>
    %43 = arith.mulf %41, %42 : vector<8x256xf32>
    %44 = arith.addf %38, %43 : vector<8x256xf32>
    %45 = vector.broadcast %19 : vector<8x1xf32> to vector<8x256xf32>
    %46 = arith.addf %44, %45 : vector<8x256xf32>
    %c0_13 = arith.constant 0 : index
    %c0_14 = arith.constant 0 : index
    %c0_15 = arith.constant 0 : index
    %47 = vector.load %arg6[%c0_13, %c0_14, %c0_15] : memref<1x8x256xf32, #tpu.memory_space<vmem>>, vector<1x8x256xf32>
    %48 = vector.shape_cast %47 : vector<1x8x256xf32> to vector<8x256xf32>
    %49 = vector.shape_cast %46 : vector<8x256xf32> to vector<1x8x256xf32>
    tpu.vector_store %arg6[%c0_13, %c0_14, %c0_15], %49 {strides = array<i32>} : memref<1x8x256xf32, #tpu.memory_space<vmem>>, vector<1x8x256xf32>,
    return
  }
  func.func @transform_0(%arg0: i32, %arg1: i32) -> (i32, i32, i32) {
    %c0_i32 = arith.constant 0 : i32
    %c0_i32_0 = arith.constant 0 : i32
    return %arg0, %c0_i32, %arg1 : i32, i32, i32
  }
  func.func @transform_1(%arg0: i32, %arg1: i32) -> (i32, i32) {
    %c0_i32 = arith.constant 0 : i32
    %c0_i32_0 = arith.constant 0 : i32
    %c0_i32_1 = arith.constant 0 : i32
    return %c0_i32, %c0_i32_0 : i32, i32
  }
  func.func @transform_2(%arg0: i32, %arg1: i32) -> (i32, i32) {
    %c0_i32 = arith.constant 0 : i32
    %c0_i32_0 = arith.constant 0 : i32
    %c0_i32_1 = arith.constant 0 : i32
    return %c0_i32, %c0_i32_0 : i32, i32
  }
  func.func @transform_3(%arg0: i32, %arg1: i32) -> (i32, i32, i32) {
    %c0_i32 = arith.constant 0 : i32
    %c0_i32_0 = arith.constant 0 : i32
    return %arg0, %c0_i32, %arg1 : i32, i32, i32
  }
  func.func @transform_4(%arg0: i32, %arg1: i32) -> (i32, i32, i32) {
    %c0_i32 = arith.constant 0 : i32
    %c0_i32_0 = arith.constant 0 : i32
    return %arg0, %c0_i32, %arg1 : i32, i32, i32
  }
}

module attributes {stable_mosaic.version = 11 : i64} {
  func.func @_mode_mix_kernel(%arg0: i32, %arg1: memref<1x4x32xf32, #tpu.memory_space<vmem>>, %arg2: memref<1x4x32xf32, #tpu.memory_space<vmem>>, %arg3: memref<4x8x32xf32, #tpu.memory_space<vmem>>, %arg4: memref<4x8x32xf32, #tpu.memory_space<vmem>>, %arg5: memref<1x8x32xf32, #tpu.memory_space<vmem>>, %arg6: memref<1x8x32xf32, #tpu.memory_space<vmem>>) attributes {dimension_semantics = [#tpu.dimension_semantics<parallel>], iteration_bounds = array<i64: 2>, scalar_prefetch = 0 : i64, scratch_operands = 0 : i64, tpu.core_type = #tpu.core_type<tc>, window_params = [{transform_indices = @transform_0, window_bounds = array<i64: 1, 4, 32>}, {transform_indices = @transform_1, window_bounds = array<i64: 1, 4, 32>}, {pipeline_mode = #tpu.pipeline_mode<synchronous>, transform_indices = @transform_2, window_bounds = array<i64: 4, 8, 32>}, {pipeline_mode = #tpu.pipeline_mode<synchronous>, transform_indices = @transform_3, window_bounds = array<i64: 4, 8, 32>}, {transform_indices = @transform_4, window_bounds = array<i64: 1, 8, 32>}, {transform_indices = @transform_5, window_bounds = array<i64: 1, 8, 32>}]} {
    %c0 = arith.constant 0 : index
    %c0_0 = arith.constant 0 : index
    %c0_1 = arith.constant 0 : index
    %0 = vector.load %arg1[%c0, %c0_0, %c0_1] : memref<1x4x32xf32, #tpu.memory_space<vmem>>, vector<1x4x32xf32>
    %1 = vector.shape_cast %0 : vector<1x4x32xf32> to vector<4x32xf32>
    %c0_2 = arith.constant 0 : index
    %c0_3 = arith.constant 0 : index
    %c0_4 = arith.constant 0 : index
    %2 = vector.load %arg2[%c0_2, %c0_3, %c0_4] : memref<1x4x32xf32, #tpu.memory_space<vmem>>, vector<1x4x32xf32>
    %3 = vector.shape_cast %2 : vector<1x4x32xf32> to vector<4x32xf32>
    %cst = arith.constant 0.000000e+00 : f32
    %4 = vector.broadcast %cst : f32 to vector<8x32xf32>
    %cst_5 = arith.constant 0.000000e+00 : f32
    %5 = vector.broadcast %cst_5 : f32 to vector<8x32xf32>
    %c0_6 = arith.constant 0 : index
    %c0_7 = arith.constant 0 : index
    %c0_8 = arith.constant 0 : index
    %6 = vector.load %arg3[%c0_6, %c0_7, %c0_8] : memref<4x8x32xf32, #tpu.memory_space<vmem>>, vector<1x8x32xf32>
    %7 = vector.shape_cast %6 : vector<1x8x32xf32> to vector<8x32xf32>
    %c0_9 = arith.constant 0 : index
    %c0_10 = arith.constant 0 : index
    %c0_11 = arith.constant 0 : index
    %8 = vector.load %arg4[%c0_9, %c0_10, %c0_11] : memref<4x8x32xf32, #tpu.memory_space<vmem>>, vector<1x8x32xf32>
    %9 = vector.shape_cast %8 : vector<1x8x32xf32> to vector<8x32xf32>
    %10 = vector.extract_strided_slice %1 {offsets = [0, 0], sizes = [1, 32], strides = [1, 1]} : vector<4x32xf32> to vector<1x32xf32>
    %11 = vector.extract_strided_slice %3 {offsets = [0, 0], sizes = [1, 32], strides = [1, 1]} : vector<4x32xf32> to vector<1x32xf32>
    %12 = vector.broadcast %10 : vector<1x32xf32> to vector<8x32xf32>
    %13 = arith.mulf %12, %7 : vector<8x32xf32>
    %14 = arith.addf %4, %13 : vector<8x32xf32>
    %15 = vector.broadcast %11 : vector<1x32xf32> to vector<8x32xf32>
    %16 = arith.mulf %15, %9 : vector<8x32xf32>
    %17 = arith.subf %14, %16 : vector<8x32xf32>
    %18 = vector.broadcast %10 : vector<1x32xf32> to vector<8x32xf32>
    %19 = arith.mulf %18, %9 : vector<8x32xf32>
    %20 = arith.addf %5, %19 : vector<8x32xf32>
    %21 = vector.broadcast %11 : vector<1x32xf32> to vector<8x32xf32>
    %22 = arith.mulf %21, %7 : vector<8x32xf32>
    %23 = arith.addf %20, %22 : vector<8x32xf32>
    %c1 = arith.constant 1 : index
    %c0_12 = arith.constant 0 : index
    %c0_13 = arith.constant 0 : index
    %24 = vector.load %arg3[%c1, %c0_12, %c0_13] : memref<4x8x32xf32, #tpu.memory_space<vmem>>, vector<1x8x32xf32>
    %25 = vector.shape_cast %24 : vector<1x8x32xf32> to vector<8x32xf32>
    %c1_14 = arith.constant 1 : index
    %c0_15 = arith.constant 0 : index
    %c0_16 = arith.constant 0 : index
    %26 = vector.load %arg4[%c1_14, %c0_15, %c0_16] : memref<4x8x32xf32, #tpu.memory_space<vmem>>, vector<1x8x32xf32>
    %27 = vector.shape_cast %26 : vector<1x8x32xf32> to vector<8x32xf32>
    %28 = vector.extract_strided_slice %1 {offsets = [1, 0], sizes = [1, 32], strides = [1, 1]} : vector<4x32xf32> to vector<1x32xf32>
    %29 = vector.extract_strided_slice %3 {offsets = [1, 0], sizes = [1, 32], strides = [1, 1]} : vector<4x32xf32> to vector<1x32xf32>
    %30 = vector.broadcast %28 : vector<1x32xf32> to vector<8x32xf32>
    %31 = arith.mulf %30, %25 : vector<8x32xf32>
    %32 = arith.addf %17, %31 : vector<8x32xf32>
    %33 = vector.broadcast %29 : vector<1x32xf32> to vector<8x32xf32>
    %34 = arith.mulf %33, %27 : vector<8x32xf32>
    %35 = arith.subf %32, %34 : vector<8x32xf32>
    %36 = vector.broadcast %28 : vector<1x32xf32> to vector<8x32xf32>
    %37 = arith.mulf %36, %27 : vector<8x32xf32>
    %38 = arith.addf %23, %37 : vector<8x32xf32>
    %39 = vector.broadcast %29 : vector<1x32xf32> to vector<8x32xf32>
    %40 = arith.mulf %39, %25 : vector<8x32xf32>
    %41 = arith.addf %38, %40 : vector<8x32xf32>
    %c2 = arith.constant 2 : index
    %c0_17 = arith.constant 0 : index
    %c0_18 = arith.constant 0 : index
    %42 = vector.load %arg3[%c2, %c0_17, %c0_18] : memref<4x8x32xf32, #tpu.memory_space<vmem>>, vector<1x8x32xf32>
    %43 = vector.shape_cast %42 : vector<1x8x32xf32> to vector<8x32xf32>
    %c2_19 = arith.constant 2 : index
    %c0_20 = arith.constant 0 : index
    %c0_21 = arith.constant 0 : index
    %44 = vector.load %arg4[%c2_19, %c0_20, %c0_21] : memref<4x8x32xf32, #tpu.memory_space<vmem>>, vector<1x8x32xf32>
    %45 = vector.shape_cast %44 : vector<1x8x32xf32> to vector<8x32xf32>
    %46 = vector.extract_strided_slice %1 {offsets = [2, 0], sizes = [1, 32], strides = [1, 1]} : vector<4x32xf32> to vector<1x32xf32>
    %47 = vector.extract_strided_slice %3 {offsets = [2, 0], sizes = [1, 32], strides = [1, 1]} : vector<4x32xf32> to vector<1x32xf32>
    %48 = vector.broadcast %46 : vector<1x32xf32> to vector<8x32xf32>
    %49 = arith.mulf %48, %43 : vector<8x32xf32>
    %50 = arith.addf %35, %49 : vector<8x32xf32>
    %51 = vector.broadcast %47 : vector<1x32xf32> to vector<8x32xf32>
    %52 = arith.mulf %51, %45 : vector<8x32xf32>
    %53 = arith.subf %50, %52 : vector<8x32xf32>
    %54 = vector.broadcast %46 : vector<1x32xf32> to vector<8x32xf32>
    %55 = arith.mulf %54, %45 : vector<8x32xf32>
    %56 = arith.addf %41, %55 : vector<8x32xf32>
    %57 = vector.broadcast %47 : vector<1x32xf32> to vector<8x32xf32>
    %58 = arith.mulf %57, %43 : vector<8x32xf32>
    %59 = arith.addf %56, %58 : vector<8x32xf32>
    %c3 = arith.constant 3 : index
    %c0_22 = arith.constant 0 : index
    %c0_23 = arith.constant 0 : index
    %60 = vector.load %arg3[%c3, %c0_22, %c0_23] : memref<4x8x32xf32, #tpu.memory_space<vmem>>, vector<1x8x32xf32>
    %61 = vector.shape_cast %60 : vector<1x8x32xf32> to vector<8x32xf32>
    %c3_24 = arith.constant 3 : index
    %c0_25 = arith.constant 0 : index
    %c0_26 = arith.constant 0 : index
    %62 = vector.load %arg4[%c3_24, %c0_25, %c0_26] : memref<4x8x32xf32, #tpu.memory_space<vmem>>, vector<1x8x32xf32>
    %63 = vector.shape_cast %62 : vector<1x8x32xf32> to vector<8x32xf32>
    %64 = vector.extract_strided_slice %1 {offsets = [3, 0], sizes = [1, 32], strides = [1, 1]} : vector<4x32xf32> to vector<1x32xf32>
    %65 = vector.extract_strided_slice %3 {offsets = [3, 0], sizes = [1, 32], strides = [1, 1]} : vector<4x32xf32> to vector<1x32xf32>
    %66 = vector.broadcast %64 : vector<1x32xf32> to vector<8x32xf32>
    %67 = arith.mulf %66, %61 : vector<8x32xf32>
    %68 = arith.addf %53, %67 : vector<8x32xf32>
    %69 = vector.broadcast %65 : vector<1x32xf32> to vector<8x32xf32>
    %70 = arith.mulf %69, %63 : vector<8x32xf32>
    %71 = arith.subf %68, %70 : vector<8x32xf32>
    %72 = vector.broadcast %64 : vector<1x32xf32> to vector<8x32xf32>
    %73 = arith.mulf %72, %63 : vector<8x32xf32>
    %74 = arith.addf %59, %73 : vector<8x32xf32>
    %75 = vector.broadcast %65 : vector<1x32xf32> to vector<8x32xf32>
    %76 = arith.mulf %75, %61 : vector<8x32xf32>
    %77 = arith.addf %74, %76 : vector<8x32xf32>
    %c0_27 = arith.constant 0 : index
    %c0_28 = arith.constant 0 : index
    %c0_29 = arith.constant 0 : index
    %78 = vector.load %arg5[%c0_27, %c0_28, %c0_29] : memref<1x8x32xf32, #tpu.memory_space<vmem>>, vector<1x8x32xf32>
    %79 = vector.shape_cast %78 : vector<1x8x32xf32> to vector<8x32xf32>
    %80 = vector.shape_cast %71 : vector<8x32xf32> to vector<1x8x32xf32>
    tpu.vector_store %arg5[%c0_27, %c0_28, %c0_29], %80 {strides = array<i32>} : memref<1x8x32xf32, #tpu.memory_space<vmem>>, vector<1x8x32xf32>,
    %c0_30 = arith.constant 0 : index
    %c0_31 = arith.constant 0 : index
    %c0_32 = arith.constant 0 : index
    %81 = vector.load %arg6[%c0_30, %c0_31, %c0_32] : memref<1x8x32xf32, #tpu.memory_space<vmem>>, vector<1x8x32xf32>
    %82 = vector.shape_cast %81 : vector<1x8x32xf32> to vector<8x32xf32>
    %83 = vector.shape_cast %77 : vector<8x32xf32> to vector<1x8x32xf32>
    tpu.vector_store %arg6[%c0_30, %c0_31, %c0_32], %83 {strides = array<i32>} : memref<1x8x32xf32, #tpu.memory_space<vmem>>, vector<1x8x32xf32>,
    return
  }
  func.func @transform_0(%arg0: i32) -> (i32, i32, i32) {
    %c0_i32 = arith.constant 0 : i32
    %c0_i32_0 = arith.constant 0 : i32
    %c0_i32_1 = arith.constant 0 : i32
    return %arg0, %c0_i32, %c0_i32_0 : i32, i32, i32
  }
  func.func @transform_1(%arg0: i32) -> (i32, i32, i32) {
    %c0_i32 = arith.constant 0 : i32
    %c0_i32_0 = arith.constant 0 : i32
    %c0_i32_1 = arith.constant 0 : i32
    return %arg0, %c0_i32, %c0_i32_0 : i32, i32, i32
  }
  func.func @transform_2(%arg0: i32) -> (i32, i32, i32) {
    %c0_i32 = arith.constant 0 : i32
    %c0_i32_0 = arith.constant 0 : i32
    %c0_i32_1 = arith.constant 0 : i32
    %c0_i32_2 = arith.constant 0 : i32
    return %c0_i32, %c0_i32_0, %c0_i32_1 : i32, i32, i32
  }
  func.func @transform_3(%arg0: i32) -> (i32, i32, i32) {
    %c0_i32 = arith.constant 0 : i32
    %c0_i32_0 = arith.constant 0 : i32
    %c0_i32_1 = arith.constant 0 : i32
    %c0_i32_2 = arith.constant 0 : i32
    return %c0_i32, %c0_i32_0, %c0_i32_1 : i32, i32, i32
  }
  func.func @transform_4(%arg0: i32) -> (i32, i32, i32) {
    %c0_i32 = arith.constant 0 : i32
    %c0_i32_0 = arith.constant 0 : i32
    %c0_i32_1 = arith.constant 0 : i32
    return %arg0, %c0_i32, %c0_i32_0 : i32, i32, i32
  }
  func.func @transform_5(%arg0: i32) -> (i32, i32, i32) {
    %c0_i32 = arith.constant 0 : i32
    %c0_i32_0 = arith.constant 0 : i32
    %c0_i32_1 = arith.constant 0 : i32
    return %arg0, %c0_i32, %c0_i32_0 : i32, i32, i32
  }
}

module attributes {stable_mosaic.version = 11 : i64} {
  func.func @_add_act_pw_kernel(%arg0: i32, %arg1: i32, %arg2: memref<1x8x256xf32, #tpu.memory_space<vmem>>, %arg3: memref<1x8x256xf32, #tpu.memory_space<vmem>>, %arg4: memref<8x8xf32, #tpu.memory_space<vmem>>, %arg5: memref<8x1xf32, #tpu.memory_space<vmem>>, %arg6: memref<1x8x256xf32, #tpu.memory_space<vmem>>, %arg7: memref<1x8x256xf32, #tpu.memory_space<vmem>>) attributes {dimension_semantics = [#tpu.dimension_semantics<parallel>, #tpu.dimension_semantics<parallel>], iteration_bounds = array<i64: 2, 1>, scalar_prefetch = 0 : i64, scratch_operands = 0 : i64, tpu.core_type = #tpu.core_type<tc>, window_params = [{transform_indices = @transform_0, window_bounds = array<i64: 1, 8, 256>}, {transform_indices = @transform_1, window_bounds = array<i64: 1, 8, 256>}, {pipeline_mode = #tpu.pipeline_mode<synchronous>, transform_indices = @transform_2, window_bounds = array<i64: 8, 8>}, {pipeline_mode = #tpu.pipeline_mode<synchronous>, transform_indices = @transform_3, window_bounds = array<i64: 8, 1>}, {transform_indices = @transform_4, window_bounds = array<i64: 1, 8, 256>}, {transform_indices = @transform_5, window_bounds = array<i64: 1, 8, 256>}]} {
    %c0 = arith.constant 0 : index
    %c0_0 = arith.constant 0 : index
    %c0_1 = arith.constant 0 : index
    %0 = vector.load %arg2[%c0, %c0_0, %c0_1] : memref<1x8x256xf32, #tpu.memory_space<vmem>>, vector<1x8x256xf32>
    %1 = vector.shape_cast %0 : vector<1x8x256xf32> to vector<8x256xf32>
    %c0_2 = arith.constant 0 : index
    %c0_3 = arith.constant 0 : index
    %c0_4 = arith.constant 0 : index
    %2 = vector.load %arg3[%c0_2, %c0_3, %c0_4] : memref<1x8x256xf32, #tpu.memory_space<vmem>>, vector<1x8x256xf32>
    %3 = vector.shape_cast %2 : vector<1x8x256xf32> to vector<8x256xf32>
    %4 = arith.addf %1, %3 : vector<8x256xf32>
    %5 = arith.mulf %4, %4 : vector<8x256xf32>
    %6 = arith.mulf %4, %5 : vector<8x256xf32>
    %cst = arith.constant 4.471500e-02 : f32
    %7 = vector.broadcast %cst : f32 to vector<8x256xf32>
    %8 = arith.mulf %7, %6 : vector<8x256xf32>
    %9 = arith.addf %4, %8 : vector<8x256xf32>
    %cst_5 = arith.constant 0.797884583 : f32
    %10 = vector.broadcast %cst_5 : f32 to vector<8x256xf32>
    %11 = arith.mulf %10, %9 : vector<8x256xf32>
    %12 = math.tanh %11 : vector<8x256xf32>
    %cst_6 = arith.constant 1.000000e+00 : f32
    %13 = vector.broadcast %cst_6 : f32 to vector<8x256xf32>
    %14 = arith.addf %13, %12 : vector<8x256xf32>
    %cst_7 = arith.constant 5.000000e-01 : f32
    %15 = vector.broadcast %cst_7 : f32 to vector<8x256xf32>
    %16 = arith.mulf %15, %14 : vector<8x256xf32>
    %17 = arith.mulf %4, %16 : vector<8x256xf32>
    %c0_8 = arith.constant 0 : index
    %c0_9 = arith.constant 0 : index
    %c0_10 = arith.constant 0 : index
    %18 = vector.load %arg6[%c0_8, %c0_9, %c0_10] : memref<1x8x256xf32, #tpu.memory_space<vmem>>, vector<1x8x256xf32>
    %19 = vector.shape_cast %18 : vector<1x8x256xf32> to vector<8x256xf32>
    %20 = vector.shape_cast %17 : vector<8x256xf32> to vector<1x8x256xf32>
    tpu.vector_store %arg6[%c0_8, %c0_9, %c0_10], %20 {strides = array<i32>} : memref<1x8x256xf32, #tpu.memory_space<vmem>>, vector<1x8x256xf32>,
    %c0_11 = arith.constant 0 : index
    %c0_12 = arith.constant 0 : index
    %21 = vector.load %arg4[%c0_11, %c0_12] : memref<8x8xf32, #tpu.memory_space<vmem>>, vector<8x8xf32>
    %c0_13 = arith.constant 0 : index
    %c0_14 = arith.constant 0 : index
    %22 = vector.load %arg5[%c0_13, %c0_14] : memref<8x1xf32, #tpu.memory_space<vmem>>, vector<8x1xf32>
    %cst_15 = arith.constant 0.000000e+00 : f32
    %23 = vector.broadcast %cst_15 : f32 to vector<8x256xf32>
    %24 = vector.extract_strided_slice %21 {offsets = [0, 0], sizes = [8, 1], strides = [1, 1]} : vector<8x8xf32> to vector<8x1xf32>
    %25 = vector.extract_strided_slice %17 {offsets = [0, 0], sizes = [1, 256], strides = [1, 1]} : vector<8x256xf32> to vector<1x256xf32>
    %26 = vector.broadcast %24 : vector<8x1xf32> to vector<8x256xf32>
    %27 = vector.broadcast %25 : vector<1x256xf32> to vector<8x256xf32>
    %28 = arith.mulf %26, %27 : vector<8x256xf32>
    %29 = arith.addf %23, %28 : vector<8x256xf32>
    %30 = vector.extract_strided_slice %21 {offsets = [0, 1], sizes = [8, 1], strides = [1, 1]} : vector<8x8xf32> to vector<8x1xf32>
    %31 = vector.extract_strided_slice %17 {offsets = [1, 0], sizes = [1, 256], strides = [1, 1]} : vector<8x256xf32> to vector<1x256xf32>
    %32 = vector.broadcast %30 : vector<8x1xf32> to vector<8x256xf32>
    %33 = vector.broadcast %31 : vector<1x256xf32> to vector<8x256xf32>
    %34 = arith.mulf %32, %33 : vector<8x256xf32>
    %35 = arith.addf %29, %34 : vector<8x256xf32>
    %36 = vector.extract_strided_slice %21 {offsets = [0, 2], sizes = [8, 1], strides = [1, 1]} : vector<8x8xf32> to vector<8x1xf32>
    %37 = vector.extract_strided_slice %17 {offsets = [2, 0], sizes = [1, 256], strides = [1, 1]} : vector<8x256xf32> to vector<1x256xf32>
    %38 = vector.broadcast %36 : vector<8x1xf32> to vector<8x256xf32>
    %39 = vector.broadcast %37 : vector<1x256xf32> to vector<8x256xf32>
    %40 = arith.mulf %38, %39 : vector<8x256xf32>
    %41 = arith.addf %35, %40 : vector<8x256xf32>
    %42 = vector.extract_strided_slice %21 {offsets = [0, 3], sizes = [8, 1], strides = [1, 1]} : vector<8x8xf32> to vector<8x1xf32>
    %43 = vector.extract_strided_slice %17 {offsets = [3, 0], sizes = [1, 256], strides = [1, 1]} : vector<8x256xf32> to vector<1x256xf32>
    %44 = vector.broadcast %42 : vector<8x1xf32> to vector<8x256xf32>
    %45 = vector.broadcast %43 : vector<1x256xf32> to vector<8x256xf32>
    %46 = arith.mulf %44, %45 : vector<8x256xf32>
    %47 = arith.addf %41, %46 : vector<8x256xf32>
    %48 = vector.extract_strided_slice %21 {offsets = [0, 4], sizes = [8, 1], strides = [1, 1]} : vector<8x8xf32> to vector<8x1xf32>
    %49 = vector.extract_strided_slice %17 {offsets = [4, 0], sizes = [1, 256], strides = [1, 1]} : vector<8x256xf32> to vector<1x256xf32>
    %50 = vector.broadcast %48 : vector<8x1xf32> to vector<8x256xf32>
    %51 = vector.broadcast %49 : vector<1x256xf32> to vector<8x256xf32>
    %52 = arith.mulf %50, %51 : vector<8x256xf32>
    %53 = arith.addf %47, %52 : vector<8x256xf32>
    %54 = vector.extract_strided_slice %21 {offsets = [0, 5], sizes = [8, 1], strides = [1, 1]} : vector<8x8xf32> to vector<8x1xf32>
    %55 = vector.extract_strided_slice %17 {offsets = [5, 0], sizes = [1, 256], strides = [1, 1]} : vector<8x256xf32> to vector<1x256xf32>
    %56 = vector.broadcast %54 : vector<8x1xf32> to vector<8x256xf32>
    %57 = vector.broadcast %55 : vector<1x256xf32> to vector<8x256xf32>
    %58 = arith.mulf %56, %57 : vector<8x256xf32>
    %59 = arith.addf %53, %58 : vector<8x256xf32>
    %60 = vector.extract_strided_slice %21 {offsets = [0, 6], sizes = [8, 1], strides = [1, 1]} : vector<8x8xf32> to vector<8x1xf32>
    %61 = vector.extract_strided_slice %17 {offsets = [6, 0], sizes = [1, 256], strides = [1, 1]} : vector<8x256xf32> to vector<1x256xf32>
    %62 = vector.broadcast %60 : vector<8x1xf32> to vector<8x256xf32>
    %63 = vector.broadcast %61 : vector<1x256xf32> to vector<8x256xf32>
    %64 = arith.mulf %62, %63 : vector<8x256xf32>
    %65 = arith.addf %59, %64 : vector<8x256xf32>
    %66 = vector.extract_strided_slice %21 {offsets = [0, 7], sizes = [8, 1], strides = [1, 1]} : vector<8x8xf32> to vector<8x1xf32>
    %67 = vector.extract_strided_slice %17 {offsets = [7, 0], sizes = [1, 256], strides = [1, 1]} : vector<8x256xf32> to vector<1x256xf32>
    %68 = vector.broadcast %66 : vector<8x1xf32> to vector<8x256xf32>
    %69 = vector.broadcast %67 : vector<1x256xf32> to vector<8x256xf32>
    %70 = arith.mulf %68, %69 : vector<8x256xf32>
    %71 = arith.addf %65, %70 : vector<8x256xf32>
    %72 = vector.broadcast %22 : vector<8x1xf32> to vector<8x256xf32>
    %73 = arith.addf %71, %72 : vector<8x256xf32>
    %c0_16 = arith.constant 0 : index
    %c0_17 = arith.constant 0 : index
    %c0_18 = arith.constant 0 : index
    %74 = vector.load %arg7[%c0_16, %c0_17, %c0_18] : memref<1x8x256xf32, #tpu.memory_space<vmem>>, vector<1x8x256xf32>
    %75 = vector.shape_cast %74 : vector<1x8x256xf32> to vector<8x256xf32>
    %76 = vector.shape_cast %73 : vector<8x256xf32> to vector<1x8x256xf32>
    tpu.vector_store %arg7[%c0_16, %c0_17, %c0_18], %76 {strides = array<i32>} : memref<1x8x256xf32, #tpu.memory_space<vmem>>, vector<1x8x256xf32>,
    return
  }
  func.func @transform_0(%arg0: i32, %arg1: i32) -> (i32, i32, i32) {
    %c0_i32 = arith.constant 0 : i32
    %c0_i32_0 = arith.constant 0 : i32
    return %arg0, %c0_i32, %arg1 : i32, i32, i32
  }
  func.func @transform_1(%arg0: i32, %arg1: i32) -> (i32, i32, i32) {
    %c0_i32 = arith.constant 0 : i32
    %c0_i32_0 = arith.constant 0 : i32
    return %arg0, %c0_i32, %arg1 : i32, i32, i32
  }
  func.func @transform_2(%arg0: i32, %arg1: i32) -> (i32, i32) {
    %c0_i32 = arith.constant 0 : i32
    %c0_i32_0 = arith.constant 0 : i32
    %c0_i32_1 = arith.constant 0 : i32
    return %c0_i32, %c0_i32_0 : i32, i32
  }
  func.func @transform_3(%arg0: i32, %arg1: i32) -> (i32, i32) {
    %c0_i32 = arith.constant 0 : i32
    %c0_i32_0 = arith.constant 0 : i32
    %c0_i32_1 = arith.constant 0 : i32
    return %c0_i32, %c0_i32_0 : i32, i32
  }
  func.func @transform_4(%arg0: i32, %arg1: i32) -> (i32, i32, i32) {
    %c0_i32 = arith.constant 0 : i32
    %c0_i32_0 = arith.constant 0 : i32
    return %arg0, %c0_i32, %arg1 : i32, i32, i32
  }
  func.func @transform_5(%arg0: i32, %arg1: i32) -> (i32, i32, i32) {
    %c0_i32 = arith.constant 0 : i32
    %c0_i32_0 = arith.constant 0 : i32
    return %arg0, %c0_i32, %arg1 : i32, i32, i32
  }
}

module attributes {stable_mosaic.version = 11 : i64} {
  func.func @_mode_mix_kernel(%arg0: i32, %arg1: memref<1x8x32xf32, #tpu.memory_space<vmem>>, %arg2: memref<1x8x32xf32, #tpu.memory_space<vmem>>, %arg3: memref<8x8x32xf32, #tpu.memory_space<vmem>>, %arg4: memref<8x8x32xf32, #tpu.memory_space<vmem>>, %arg5: memref<1x8x32xf32, #tpu.memory_space<vmem>>, %arg6: memref<1x8x32xf32, #tpu.memory_space<vmem>>) attributes {dimension_semantics = [#tpu.dimension_semantics<parallel>], iteration_bounds = array<i64: 2>, scalar_prefetch = 0 : i64, scratch_operands = 0 : i64, tpu.core_type = #tpu.core_type<tc>, window_params = [{transform_indices = @transform_0, window_bounds = array<i64: 1, 8, 32>}, {transform_indices = @transform_1, window_bounds = array<i64: 1, 8, 32>}, {pipeline_mode = #tpu.pipeline_mode<synchronous>, transform_indices = @transform_2, window_bounds = array<i64: 8, 8, 32>}, {pipeline_mode = #tpu.pipeline_mode<synchronous>, transform_indices = @transform_3, window_bounds = array<i64: 8, 8, 32>}, {transform_indices = @transform_4, window_bounds = array<i64: 1, 8, 32>}, {transform_indices = @transform_5, window_bounds = array<i64: 1, 8, 32>}]} {
    %c0 = arith.constant 0 : index
    %c0_0 = arith.constant 0 : index
    %c0_1 = arith.constant 0 : index
    %0 = vector.load %arg1[%c0, %c0_0, %c0_1] : memref<1x8x32xf32, #tpu.memory_space<vmem>>, vector<1x8x32xf32>
    %1 = vector.shape_cast %0 : vector<1x8x32xf32> to vector<8x32xf32>
    %c0_2 = arith.constant 0 : index
    %c0_3 = arith.constant 0 : index
    %c0_4 = arith.constant 0 : index
    %2 = vector.load %arg2[%c0_2, %c0_3, %c0_4] : memref<1x8x32xf32, #tpu.memory_space<vmem>>, vector<1x8x32xf32>
    %3 = vector.shape_cast %2 : vector<1x8x32xf32> to vector<8x32xf32>
    %cst = arith.constant 0.000000e+00 : f32
    %4 = vector.broadcast %cst : f32 to vector<8x32xf32>
    %cst_5 = arith.constant 0.000000e+00 : f32
    %5 = vector.broadcast %cst_5 : f32 to vector<8x32xf32>
    %c0_6 = arith.constant 0 : index
    %c0_7 = arith.constant 0 : index
    %c0_8 = arith.constant 0 : index
    %6 = vector.load %arg3[%c0_6, %c0_7, %c0_8] : memref<8x8x32xf32, #tpu.memory_space<vmem>>, vector<1x8x32xf32>
    %7 = vector.shape_cast %6 : vector<1x8x32xf32> to vector<8x32xf32>
    %c0_9 = arith.constant 0 : index
    %c0_10 = arith.constant 0 : index
    %c0_11 = arith.constant 0 : index
    %8 = vector.load %arg4[%c0_9, %c0_10, %c0_11] : memref<8x8x32xf32, #tpu.memory_space<vmem>>, vector<1x8x32xf32>
    %9 = vector.shape_cast %8 : vector<1x8x32xf32> to vector<8x32xf32>
    %10 = vector.extract_strided_slice %1 {offsets = [0, 0], sizes = [1, 32], strides = [1, 1]} : vector<8x32xf32> to vector<1x32xf32>
    %11 = vector.extract_strided_slice %3 {offsets = [0, 0], sizes = [1, 32], strides = [1, 1]} : vector<8x32xf32> to vector<1x32xf32>
    %12 = vector.broadcast %10 : vector<1x32xf32> to vector<8x32xf32>
    %13 = arith.mulf %12, %7 : vector<8x32xf32>
    %14 = arith.addf %4, %13 : vector<8x32xf32>
    %15 = vector.broadcast %11 : vector<1x32xf32> to vector<8x32xf32>
    %16 = arith.mulf %15, %9 : vector<8x32xf32>
    %17 = arith.subf %14, %16 : vector<8x32xf32>
    %18 = vector.broadcast %10 : vector<1x32xf32> to vector<8x32xf32>
    %19 = arith.mulf %18, %9 : vector<8x32xf32>
    %20 = arith.addf %5, %19 : vector<8x32xf32>
    %21 = vector.broadcast %11 : vector<1x32xf32> to vector<8x32xf32>
    %22 = arith.mulf %21, %7 : vector<8x32xf32>
    %23 = arith.addf %20, %22 : vector<8x32xf32>
    %c1 = arith.constant 1 : index
    %c0_12 = arith.constant 0 : index
    %c0_13 = arith.constant 0 : index
    %24 = vector.load %arg3[%c1, %c0_12, %c0_13] : memref<8x8x32xf32, #tpu.memory_space<vmem>>, vector<1x8x32xf32>
    %25 = vector.shape_cast %24 : vector<1x8x32xf32> to vector<8x32xf32>
    %c1_14 = arith.constant 1 : index
    %c0_15 = arith.constant 0 : index
    %c0_16 = arith.constant 0 : index
    %26 = vector.load %arg4[%c1_14, %c0_15, %c0_16] : memref<8x8x32xf32, #tpu.memory_space<vmem>>, vector<1x8x32xf32>
    %27 = vector.shape_cast %26 : vector<1x8x32xf32> to vector<8x32xf32>
    %28 = vector.extract_strided_slice %1 {offsets = [1, 0], sizes = [1, 32], strides = [1, 1]} : vector<8x32xf32> to vector<1x32xf32>
    %29 = vector.extract_strided_slice %3 {offsets = [1, 0], sizes = [1, 32], strides = [1, 1]} : vector<8x32xf32> to vector<1x32xf32>
    %30 = vector.broadcast %28 : vector<1x32xf32> to vector<8x32xf32>
    %31 = arith.mulf %30, %25 : vector<8x32xf32>
    %32 = arith.addf %17, %31 : vector<8x32xf32>
    %33 = vector.broadcast %29 : vector<1x32xf32> to vector<8x32xf32>
    %34 = arith.mulf %33, %27 : vector<8x32xf32>
    %35 = arith.subf %32, %34 : vector<8x32xf32>
    %36 = vector.broadcast %28 : vector<1x32xf32> to vector<8x32xf32>
    %37 = arith.mulf %36, %27 : vector<8x32xf32>
    %38 = arith.addf %23, %37 : vector<8x32xf32>
    %39 = vector.broadcast %29 : vector<1x32xf32> to vector<8x32xf32>
    %40 = arith.mulf %39, %25 : vector<8x32xf32>
    %41 = arith.addf %38, %40 : vector<8x32xf32>
    %c2 = arith.constant 2 : index
    %c0_17 = arith.constant 0 : index
    %c0_18 = arith.constant 0 : index
    %42 = vector.load %arg3[%c2, %c0_17, %c0_18] : memref<8x8x32xf32, #tpu.memory_space<vmem>>, vector<1x8x32xf32>
    %43 = vector.shape_cast %42 : vector<1x8x32xf32> to vector<8x32xf32>
    %c2_19 = arith.constant 2 : index
    %c0_20 = arith.constant 0 : index
    %c0_21 = arith.constant 0 : index
    %44 = vector.load %arg4[%c2_19, %c0_20, %c0_21] : memref<8x8x32xf32, #tpu.memory_space<vmem>>, vector<1x8x32xf32>
    %45 = vector.shape_cast %44 : vector<1x8x32xf32> to vector<8x32xf32>
    %46 = vector.extract_strided_slice %1 {offsets = [2, 0], sizes = [1, 32], strides = [1, 1]} : vector<8x32xf32> to vector<1x32xf32>
    %47 = vector.extract_strided_slice %3 {offsets = [2, 0], sizes = [1, 32], strides = [1, 1]} : vector<8x32xf32> to vector<1x32xf32>
    %48 = vector.broadcast %46 : vector<1x32xf32> to vector<8x32xf32>
    %49 = arith.mulf %48, %43 : vector<8x32xf32>
    %50 = arith.addf %35, %49 : vector<8x32xf32>
    %51 = vector.broadcast %47 : vector<1x32xf32> to vector<8x32xf32>
    %52 = arith.mulf %51, %45 : vector<8x32xf32>
    %53 = arith.subf %50, %52 : vector<8x32xf32>
    %54 = vector.broadcast %46 : vector<1x32xf32> to vector<8x32xf32>
    %55 = arith.mulf %54, %45 : vector<8x32xf32>
    %56 = arith.addf %41, %55 : vector<8x32xf32>
    %57 = vector.broadcast %47 : vector<1x32xf32> to vector<8x32xf32>
    %58 = arith.mulf %57, %43 : vector<8x32xf32>
    %59 = arith.addf %56, %58 : vector<8x32xf32>
    %c3 = arith.constant 3 : index
    %c0_22 = arith.constant 0 : index
    %c0_23 = arith.constant 0 : index
    %60 = vector.load %arg3[%c3, %c0_22, %c0_23] : memref<8x8x32xf32, #tpu.memory_space<vmem>>, vector<1x8x32xf32>
    %61 = vector.shape_cast %60 : vector<1x8x32xf32> to vector<8x32xf32>
    %c3_24 = arith.constant 3 : index
    %c0_25 = arith.constant 0 : index
    %c0_26 = arith.constant 0 : index
    %62 = vector.load %arg4[%c3_24, %c0_25, %c0_26] : memref<8x8x32xf32, #tpu.memory_space<vmem>>, vector<1x8x32xf32>
    %63 = vector.shape_cast %62 : vector<1x8x32xf32> to vector<8x32xf32>
    %64 = vector.extract_strided_slice %1 {offsets = [3, 0], sizes = [1, 32], strides = [1, 1]} : vector<8x32xf32> to vector<1x32xf32>
    %65 = vector.extract_strided_slice %3 {offsets = [3, 0], sizes = [1, 32], strides = [1, 1]} : vector<8x32xf32> to vector<1x32xf32>
    %66 = vector.broadcast %64 : vector<1x32xf32> to vector<8x32xf32>
    %67 = arith.mulf %66, %61 : vector<8x32xf32>
    %68 = arith.addf %53, %67 : vector<8x32xf32>
    %69 = vector.broadcast %65 : vector<1x32xf32> to vector<8x32xf32>
    %70 = arith.mulf %69, %63 : vector<8x32xf32>
    %71 = arith.subf %68, %70 : vector<8x32xf32>
    %72 = vector.broadcast %64 : vector<1x32xf32> to vector<8x32xf32>
    %73 = arith.mulf %72, %63 : vector<8x32xf32>
    %74 = arith.addf %59, %73 : vector<8x32xf32>
    %75 = vector.broadcast %65 : vector<1x32xf32> to vector<8x32xf32>
    %76 = arith.mulf %75, %61 : vector<8x32xf32>
    %77 = arith.addf %74, %76 : vector<8x32xf32>
    %c4 = arith.constant 4 : index
    %c0_27 = arith.constant 0 : index
    %c0_28 = arith.constant 0 : index
    %78 = vector.load %arg3[%c4, %c0_27, %c0_28] : memref<8x8x32xf32, #tpu.memory_space<vmem>>, vector<1x8x32xf32>
    %79 = vector.shape_cast %78 : vector<1x8x32xf32> to vector<8x32xf32>
    %c4_29 = arith.constant 4 : index
    %c0_30 = arith.constant 0 : index
    %c0_31 = arith.constant 0 : index
    %80 = vector.load %arg4[%c4_29, %c0_30, %c0_31] : memref<8x8x32xf32, #tpu.memory_space<vmem>>, vector<1x8x32xf32>
    %81 = vector.shape_cast %80 : vector<1x8x32xf32> to vector<8x32xf32>
    %82 = vector.extract_strided_slice %1 {offsets = [4, 0], sizes = [1, 32], strides = [1, 1]} : vector<8x32xf32> to vector<1x32xf32>
    %83 = vector.extract_strided_slice %3 {offsets = [4, 0], sizes = [1, 32], strides = [1, 1]} : vector<8x32xf32> to vector<1x32xf32>
    %84 = vector.broadcast %82 : vector<1x32xf32> to vector<8x32xf32>
    %85 = arith.mulf %84, %79 : vector<8x32xf32>
    %86 = arith.addf %71, %85 : vector<8x32xf32>
    %87 = vector.broadcast %83 : vector<1x32xf32> to vector<8x32xf32>
    %88 = arith.mulf %87, %81 : vector<8x32xf32>
    %89 = arith.subf %86, %88 : vector<8x32xf32>
    %90 = vector.broadcast %82 : vector<1x32xf32> to vector<8x32xf32>
    %91 = arith.mulf %90, %81 : vector<8x32xf32>
    %92 = arith.addf %77, %91 : vector<8x32xf32>
    %93 = vector.broadcast %83 : vector<1x32xf32> to vector<8x32xf32>
    %94 = arith.mulf %93, %79 : vector<8x32xf32>
    %95 = arith.addf %92, %94 : vector<8x32xf32>
    %c5 = arith.constant 5 : index
    %c0_32 = arith.constant 0 : index
    %c0_33 = arith.constant 0 : index
    %96 = vector.load %arg3[%c5, %c0_32, %c0_33] : memref<8x8x32xf32, #tpu.memory_space<vmem>>, vector<1x8x32xf32>
    %97 = vector.shape_cast %96 : vector<1x8x32xf32> to vector<8x32xf32>
    %c5_34 = arith.constant 5 : index
    %c0_35 = arith.constant 0 : index
    %c0_36 = arith.constant 0 : index
    %98 = vector.load %arg4[%c5_34, %c0_35, %c0_36] : memref<8x8x32xf32, #tpu.memory_space<vmem>>, vector<1x8x32xf32>
    %99 = vector.shape_cast %98 : vector<1x8x32xf32> to vector<8x32xf32>
    %100 = vector.extract_strided_slice %1 {offsets = [5, 0], sizes = [1, 32], strides = [1, 1]} : vector<8x32xf32> to vector<1x32xf32>
    %101 = vector.extract_strided_slice %3 {offsets = [5, 0], sizes = [1, 32], strides = [1, 1]} : vector<8x32xf32> to vector<1x32xf32>
    %102 = vector.broadcast %100 : vector<1x32xf32> to vector<8x32xf32>
    %103 = arith.mulf %102, %97 : vector<8x32xf32>
    %104 = arith.addf %89, %103 : vector<8x32xf32>
    %105 = vector.broadcast %101 : vector<1x32xf32> to vector<8x32xf32>
    %106 = arith.mulf %105, %99 : vector<8x32xf32>
    %107 = arith.subf %104, %106 : vector<8x32xf32>
    %108 = vector.broadcast %100 : vector<1x32xf32> to vector<8x32xf32>
    %109 = arith.mulf %108, %99 : vector<8x32xf32>
    %110 = arith.addf %95, %109 : vector<8x32xf32>
    %111 = vector.broadcast %101 : vector<1x32xf32> to vector<8x32xf32>
    %112 = arith.mulf %111, %97 : vector<8x32xf32>
    %113 = arith.addf %110, %112 : vector<8x32xf32>
    %c6 = arith.constant 6 : index
    %c0_37 = arith.constant 0 : index
    %c0_38 = arith.constant 0 : index
    %114 = vector.load %arg3[%c6, %c0_37, %c0_38] : memref<8x8x32xf32, #tpu.memory_space<vmem>>, vector<1x8x32xf32>
    %115 = vector.shape_cast %114 : vector<1x8x32xf32> to vector<8x32xf32>
    %c6_39 = arith.constant 6 : index
    %c0_40 = arith.constant 0 : index
    %c0_41 = arith.constant 0 : index
    %116 = vector.load %arg4[%c6_39, %c0_40, %c0_41] : memref<8x8x32xf32, #tpu.memory_space<vmem>>, vector<1x8x32xf32>
    %117 = vector.shape_cast %116 : vector<1x8x32xf32> to vector<8x32xf32>
    %118 = vector.extract_strided_slice %1 {offsets = [6, 0], sizes = [1, 32], strides = [1, 1]} : vector<8x32xf32> to vector<1x32xf32>
    %119 = vector.extract_strided_slice %3 {offsets = [6, 0], sizes = [1, 32], strides = [1, 1]} : vector<8x32xf32> to vector<1x32xf32>
    %120 = vector.broadcast %118 : vector<1x32xf32> to vector<8x32xf32>
    %121 = arith.mulf %120, %115 : vector<8x32xf32>
    %122 = arith.addf %107, %121 : vector<8x32xf32>
    %123 = vector.broadcast %119 : vector<1x32xf32> to vector<8x32xf32>
    %124 = arith.mulf %123, %117 : vector<8x32xf32>
    %125 = arith.subf %122, %124 : vector<8x32xf32>
    %126 = vector.broadcast %118 : vector<1x32xf32> to vector<8x32xf32>
    %127 = arith.mulf %126, %117 : vector<8x32xf32>
    %128 = arith.addf %113, %127 : vector<8x32xf32>
    %129 = vector.broadcast %119 : vector<1x32xf32> to vector<8x32xf32>
    %130 = arith.mulf %129, %115 : vector<8x32xf32>
    %131 = arith.addf %128, %130 : vector<8x32xf32>
    %c7 = arith.constant 7 : index
    %c0_42 = arith.constant 0 : index
    %c0_43 = arith.constant 0 : index
    %132 = vector.load %arg3[%c7, %c0_42, %c0_43] : memref<8x8x32xf32, #tpu.memory_space<vmem>>, vector<1x8x32xf32>
    %133 = vector.shape_cast %132 : vector<1x8x32xf32> to vector<8x32xf32>
    %c7_44 = arith.constant 7 : index
    %c0_45 = arith.constant 0 : index
    %c0_46 = arith.constant 0 : index
    %134 = vector.load %arg4[%c7_44, %c0_45, %c0_46] : memref<8x8x32xf32, #tpu.memory_space<vmem>>, vector<1x8x32xf32>
    %135 = vector.shape_cast %134 : vector<1x8x32xf32> to vector<8x32xf32>
    %136 = vector.extract_strided_slice %1 {offsets = [7, 0], sizes = [1, 32], strides = [1, 1]} : vector<8x32xf32> to vector<1x32xf32>
    %137 = vector.extract_strided_slice %3 {offsets = [7, 0], sizes = [1, 32], strides = [1, 1]} : vector<8x32xf32> to vector<1x32xf32>
    %138 = vector.broadcast %136 : vector<1x32xf32> to vector<8x32xf32>
    %139 = arith.mulf %138, %133 : vector<8x32xf32>
    %140 = arith.addf %125, %139 : vector<8x32xf32>
    %141 = vector.broadcast %137 : vector<1x32xf32> to vector<8x32xf32>
    %142 = arith.mulf %141, %135 : vector<8x32xf32>
    %143 = arith.subf %140, %142 : vector<8x32xf32>
    %144 = vector.broadcast %136 : vector<1x32xf32> to vector<8x32xf32>
    %145 = arith.mulf %144, %135 : vector<8x32xf32>
    %146 = arith.addf %131, %145 : vector<8x32xf32>
    %147 = vector.broadcast %137 : vector<1x32xf32> to vector<8x32xf32>
    %148 = arith.mulf %147, %133 : vector<8x32xf32>
    %149 = arith.addf %146, %148 : vector<8x32xf32>
    %c0_47 = arith.constant 0 : index
    %c0_48 = arith.constant 0 : index
    %c0_49 = arith.constant 0 : index
    %150 = vector.load %arg5[%c0_47, %c0_48, %c0_49] : memref<1x8x32xf32, #tpu.memory_space<vmem>>, vector<1x8x32xf32>
    %151 = vector.shape_cast %150 : vector<1x8x32xf32> to vector<8x32xf32>
    %152 = vector.shape_cast %143 : vector<8x32xf32> to vector<1x8x32xf32>
    tpu.vector_store %arg5[%c0_47, %c0_48, %c0_49], %152 {strides = array<i32>} : memref<1x8x32xf32, #tpu.memory_space<vmem>>, vector<1x8x32xf32>,
    %c0_50 = arith.constant 0 : index
    %c0_51 = arith.constant 0 : index
    %c0_52 = arith.constant 0 : index
    %153 = vector.load %arg6[%c0_50, %c0_51, %c0_52] : memref<1x8x32xf32, #tpu.memory_space<vmem>>, vector<1x8x32xf32>
    %154 = vector.shape_cast %153 : vector<1x8x32xf32> to vector<8x32xf32>
    %155 = vector.shape_cast %149 : vector<8x32xf32> to vector<1x8x32xf32>
    tpu.vector_store %arg6[%c0_50, %c0_51, %c0_52], %155 {strides = array<i32>} : memref<1x8x32xf32, #tpu.memory_space<vmem>>, vector<1x8x32xf32>,
    return
  }
  func.func @transform_0(%arg0: i32) -> (i32, i32, i32) {
    %c0_i32 = arith.constant 0 : i32
    %c0_i32_0 = arith.constant 0 : i32
    %c0_i32_1 = arith.constant 0 : i32
    return %arg0, %c0_i32, %c0_i32_0 : i32, i32, i32
  }
  func.func @transform_1(%arg0: i32) -> (i32, i32, i32) {
    %c0_i32 = arith.constant 0 : i32
    %c0_i32_0 = arith.constant 0 : i32
    %c0_i32_1 = arith.constant 0 : i32
    return %arg0, %c0_i32, %c0_i32_0 : i32, i32, i32
  }
  func.func @transform_2(%arg0: i32) -> (i32, i32, i32) {
    %c0_i32 = arith.constant 0 : i32
    %c0_i32_0 = arith.constant 0 : i32
    %c0_i32_1 = arith.constant 0 : i32
    %c0_i32_2 = arith.constant 0 : i32
    return %c0_i32, %c0_i32_0, %c0_i32_1 : i32, i32, i32
  }
  func.func @transform_3(%arg0: i32) -> (i32, i32, i32) {
    %c0_i32 = arith.constant 0 : i32
    %c0_i32_0 = arith.constant 0 : i32
    %c0_i32_1 = arith.constant 0 : i32
    %c0_i32_2 = arith.constant 0 : i32
    return %c0_i32, %c0_i32_0, %c0_i32_1 : i32, i32, i32
  }
  func.func @transform_4(%arg0: i32) -> (i32, i32, i32) {
    %c0_i32 = arith.constant 0 : i32
    %c0_i32_0 = arith.constant 0 : i32
    %c0_i32_1 = arith.constant 0 : i32
    return %arg0, %c0_i32, %c0_i32_0 : i32, i32, i32
  }
  func.func @transform_5(%arg0: i32) -> (i32, i32, i32) {
    %c0_i32 = arith.constant 0 : i32
    %c0_i32_0 = arith.constant 0 : i32
    %c0_i32_1 = arith.constant 0 : i32
    return %arg0, %c0_i32, %c0_i32_0 : i32, i32, i32
  }
}

module attributes {stable_mosaic.version = 11 : i64} {
  func.func @_final_conv_sc_kernel(%arg0: i32, %arg1: i32, %arg2: memref<1x8x256xf32, #tpu.memory_space<vmem>>, %arg3: memref<1x8x256xf32, #tpu.memory_space<vmem>>, %arg4: memref<1x4x256xf32, #tpu.memory_space<vmem>>, %arg5: memref<8x4xf32, #tpu.memory_space<vmem>>, %arg6: memref<8x1xf32, #tpu.memory_space<vmem>>, %arg7: memref<1x8x256xf32, #tpu.memory_space<vmem>>) attributes {dimension_semantics = [#tpu.dimension_semantics<parallel>, #tpu.dimension_semantics<parallel>], iteration_bounds = array<i64: 2, 1>, scalar_prefetch = 0 : i64, scratch_operands = 0 : i64, tpu.core_type = #tpu.core_type<tc>, window_params = [{transform_indices = @transform_0, window_bounds = array<i64: 1, 8, 256>}, {transform_indices = @transform_1, window_bounds = array<i64: 1, 8, 256>}, {transform_indices = @transform_2, window_bounds = array<i64: 1, 4, 256>}, {pipeline_mode = #tpu.pipeline_mode<synchronous>, transform_indices = @transform_3, window_bounds = array<i64: 8, 4>}, {pipeline_mode = #tpu.pipeline_mode<synchronous>, transform_indices = @transform_4, window_bounds = array<i64: 8, 1>}, {transform_indices = @transform_5, window_bounds = array<i64: 1, 8, 256>}]} {
    %c0 = arith.constant 0 : index
    %c0_0 = arith.constant 0 : index
    %c0_1 = arith.constant 0 : index
    %0 = vector.load %arg2[%c0, %c0_0, %c0_1] : memref<1x8x256xf32, #tpu.memory_space<vmem>>, vector<1x8x256xf32>
    %1 = vector.shape_cast %0 : vector<1x8x256xf32> to vector<8x256xf32>
    %c0_2 = arith.constant 0 : index
    %c0_3 = arith.constant 0 : index
    %c0_4 = arith.constant 0 : index
    %2 = vector.load %arg3[%c0_2, %c0_3, %c0_4] : memref<1x8x256xf32, #tpu.memory_space<vmem>>, vector<1x8x256xf32>
    %3 = vector.shape_cast %2 : vector<1x8x256xf32> to vector<8x256xf32>
    %4 = arith.addf %1, %3 : vector<8x256xf32>
    %c0_5 = arith.constant 0 : index
    %c0_6 = arith.constant 0 : index
    %c0_7 = arith.constant 0 : index
    %5 = vector.load %arg4[%c0_5, %c0_6, %c0_7] : memref<1x4x256xf32, #tpu.memory_space<vmem>>, vector<1x4x256xf32>
    %6 = vector.shape_cast %5 : vector<1x4x256xf32> to vector<4x256xf32>
    %c0_8 = arith.constant 0 : index
    %c0_9 = arith.constant 0 : index
    %7 = vector.load %arg5[%c0_8, %c0_9] : memref<8x4xf32, #tpu.memory_space<vmem>>, vector<8x4xf32>
    %c0_10 = arith.constant 0 : index
    %c0_11 = arith.constant 0 : index
    %8 = vector.load %arg6[%c0_10, %c0_11] : memref<8x1xf32, #tpu.memory_space<vmem>>, vector<8x1xf32>
    %cst = arith.constant 0.000000e+00 : f32
    %9 = vector.broadcast %cst : f32 to vector<8x256xf32>
    %10 = vector.extract_strided_slice %7 {offsets = [0, 0], sizes = [8, 1], strides = [1, 1]} : vector<8x4xf32> to vector<8x1xf32>
    %11 = vector.extract_strided_slice %6 {offsets = [0, 0], sizes = [1, 256], strides = [1, 1]} : vector<4x256xf32> to vector<1x256xf32>
    %12 = vector.broadcast %10 : vector<8x1xf32> to vector<8x256xf32>
    %13 = vector.broadcast %11 : vector<1x256xf32> to vector<8x256xf32>
    %14 = arith.mulf %12, %13 : vector<8x256xf32>
    %15 = arith.addf %9, %14 : vector<8x256xf32>
    %16 = vector.extract_strided_slice %7 {offsets = [0, 1], sizes = [8, 1], strides = [1, 1]} : vector<8x4xf32> to vector<8x1xf32>
    %17 = vector.extract_strided_slice %6 {offsets = [1, 0], sizes = [1, 256], strides = [1, 1]} : vector<4x256xf32> to vector<1x256xf32>
    %18 = vector.broadcast %16 : vector<8x1xf32> to vector<8x256xf32>
    %19 = vector.broadcast %17 : vector<1x256xf32> to vector<8x256xf32>
    %20 = arith.mulf %18, %19 : vector<8x256xf32>
    %21 = arith.addf %15, %20 : vector<8x256xf32>
    %22 = vector.extract_strided_slice %7 {offsets = [0, 2], sizes = [8, 1], strides = [1, 1]} : vector<8x4xf32> to vector<8x1xf32>
    %23 = vector.extract_strided_slice %6 {offsets = [2, 0], sizes = [1, 256], strides = [1, 1]} : vector<4x256xf32> to vector<1x256xf32>
    %24 = vector.broadcast %22 : vector<8x1xf32> to vector<8x256xf32>
    %25 = vector.broadcast %23 : vector<1x256xf32> to vector<8x256xf32>
    %26 = arith.mulf %24, %25 : vector<8x256xf32>
    %27 = arith.addf %21, %26 : vector<8x256xf32>
    %28 = vector.extract_strided_slice %7 {offsets = [0, 3], sizes = [8, 1], strides = [1, 1]} : vector<8x4xf32> to vector<8x1xf32>
    %29 = vector.extract_strided_slice %6 {offsets = [3, 0], sizes = [1, 256], strides = [1, 1]} : vector<4x256xf32> to vector<1x256xf32>
    %30 = vector.broadcast %28 : vector<8x1xf32> to vector<8x256xf32>
    %31 = vector.broadcast %29 : vector<1x256xf32> to vector<8x256xf32>
    %32 = arith.mulf %30, %31 : vector<8x256xf32>
    %33 = arith.addf %27, %32 : vector<8x256xf32>
    %34 = vector.broadcast %8 : vector<8x1xf32> to vector<8x256xf32>
    %35 = arith.addf %33, %34 : vector<8x256xf32>
    %36 = arith.addf %4, %35 : vector<8x256xf32>
    %c0_12 = arith.constant 0 : index
    %c0_13 = arith.constant 0 : index
    %c0_14 = arith.constant 0 : index
    %37 = vector.load %arg7[%c0_12, %c0_13, %c0_14] : memref<1x8x256xf32, #tpu.memory_space<vmem>>, vector<1x8x256xf32>
    %38 = vector.shape_cast %37 : vector<1x8x256xf32> to vector<8x256xf32>
    %39 = vector.shape_cast %36 : vector<8x256xf32> to vector<1x8x256xf32>
    tpu.vector_store %arg7[%c0_12, %c0_13, %c0_14], %39 {strides = array<i32>} : memref<1x8x256xf32, #tpu.memory_space<vmem>>, vector<1x8x256xf32>,
    return
  }
  func.func @transform_0(%arg0: i32, %arg1: i32) -> (i32, i32, i32) {
    %c0_i32 = arith.constant 0 : i32
    %c0_i32_0 = arith.constant 0 : i32
    return %arg0, %c0_i32, %arg1 : i32, i32, i32
  }
  func.func @transform_1(%arg0: i32, %arg1: i32) -> (i32, i32, i32) {
    %c0_i32 = arith.constant 0 : i32
    %c0_i32_0 = arith.constant 0 : i32
    return %arg0, %c0_i32, %arg1 : i32, i32, i32
  }
  func.func @transform_2(%arg0: i32, %arg1: i32) -> (i32, i32, i32) {
    %c0_i32 = arith.constant 0 : i32
    %c0_i32_0 = arith.constant 0 : i32
    return %arg0, %c0_i32, %arg1 : i32, i32, i32
  }
  func.func @transform_3(%arg0: i32, %arg1: i32) -> (i32, i32) {
    %c0_i32 = arith.constant 0 : i32
    %c0_i32_0 = arith.constant 0 : i32
    %c0_i32_1 = arith.constant 0 : i32
    return %c0_i32, %c0_i32_0 : i32, i32
  }
  func.func @transform_4(%arg0: i32, %arg1: i32) -> (i32, i32) {
    %c0_i32 = arith.constant 0 : i32
    %c0_i32_0 = arith.constant 0 : i32
    %c0_i32_1 = arith.constant 0 : i32
    return %c0_i32, %c0_i32_0 : i32, i32
  }
  func.func @transform_5(%arg0: i32, %arg1: i32) -> (i32, i32, i32) {
    %c0_i32 = arith.constant 0 : i32
    %c0_i32_0 = arith.constant 0 : i32
    return %arg0, %c0_i32, %arg1 : i32, i32, i32
  }
}

</mosaic_0001>

<bundles_post_ra>
// kernel: _lambda_.5
= control target key start
LH: loop header
LB: loop body
LE: loop exit
PB: predicated region body
PF: predicated region fallthrough
CT: control target
= control target key end

     0   :  { %s631_s15 = smov 0   ;;  %s633_s16 = smov 0   ;;  %s677_s0 = inlined_call_operand.vmem [shape: f32[2,4,256], index: 0, kind: input, shape index: {}]   ;;  %s678_s1 = inlined_call_operand.vmem [shape: f32[8,4], index: 1, kind: input, shape index: {}]   ;;  %s679_s2 = inlined_call_operand.vmem [shape: f32[8,1], index: 2, kind: input, shape index: {}]   ;;  %s680_s3 = inlined_call_operand.vmem [shape: f32[2,4,256], index: 3, kind: output, shape index: {0}]   ;;  %s681_s4 = inlined_call_operand.vmem [shape: f32[2,8,256], index: 4, kind: output, shape index: {1}]  }
   0x1   :  { %s635_s17 = smov 0  }
   0x2 LB: > { %s27_s18 = sadd.s32 1, %s596_s16  ;;  %p530_p0 = scmp.ge.s32.totalorder %s600_s17, 1  ;;  %s600_s17 = sphi %s635_s17, %s15_s17   ;;  %s596_s16 = sphi %s633_s16, %s683_s16   ;;  %s592_s15 = sphi %s631_s15, %s682_s15  }
   0x3   : > { %p29_p1 = scmp.ge.s32.totalorder %s27_s18, 2  ;;  %p188_p2 = scmp.lt.s32.totalorder %s600_s17, 3 }
   0x5   : > { %s685_s18 = smov (%p29_p1, %s27_s18), 0  ;;  %p189_p3 = pnand %p530_p0, %p188_p2 }
   0x6   : > { %v272_v0 = vld [vmem:[%s678_s1] sm:$0xff] (!%p189_p3)  ;;  %v602_v1 = vmov (!%p189_p3), 0   ;;  %v603_v2 = vmov (!%p189_p3), 2   ;;  %p232_p4 = scmp.lt.s32.totalorder (!%p189_p3), %s592_s15, 1  ;;  %v604_v3 = vmov (!%p189_p3), 1   ;;  %v605_v4 = vmov (!%p189_p3), 3  }
   0x7   : > { %192 = sbr.rel (%p189_p3) target bundleno = 152 (0x98), region = 32  ;;  %570 = vset.pattern.permute.xlu0 (!%p189_p3), %v602_v1  ;;  %572 = vset.pattern.permute.xlu1 (!%p189_p3), %v603_v2  ;;  %v273_v7 = vld [vmem:[%s679_s2] sm:$0xff] (!%p189_p3)  ;;  %v280_v16 = vlaneseq (!%p189_p3) }
   0x8   : > { %276 = vperm.xlu0 (!%p189_p3), %570, %v272_v0   ;;  %329 = vperm.xlu1 (!%p189_p3), %572, %v272_v0  }
   0x9   : > { %v281_v17 = vshrl.u32 (!%p189_p3), %v280_v16, 7 }
   0xb   : > { %v282_v18 = vsub.s32 (!%p189_p3), 0, %v281_v17  ;;  %v286_v19 = vsub.s32 (!%p189_p3), 4, %v281_v17  ;;  %v308_v20 = vsub.s32 (!%p189_p3), 1, %v281_v17  ;;  %v312_v21 = vsub.s32 (!%p189_p3), 5, %v281_v17 }
   0xc   : > { %571 = vset.pattern.permute.xlu0 (!%p189_p3), %v604_v3  ;;  %573 = vset.pattern.permute.xlu1 (!%p189_p3), %v605_v4  ;;  %v334_v22 = vsub.s32 (!%p189_p3), 2, %v281_v17  ;;  %v338_v23 = vsub.s32 (!%p189_p3), 6, %v281_v17  ;;  %v360_v24 = vsub.s32 (!%p189_p3), 3, %v281_v17  ;;  %v364_v25 = vsub.s32 (!%p189_p3), 7, %v281_v17 }
   0xd   : > { %303 = vperm.xlu0 (!%p189_p3), %571, %v272_v0   ;;  %355 = vperm.xlu1 (!%p189_p3), %573, %v272_v0  }
   0xe   : > { %s687_s15 = smov (!%p232_p4, %s592_s15), 1 }
   0xf   : > { %s539_s21 = sshll.u32 %s687_s15, 3  ;;  %s541_s30 = sshll.u32 %s687_s15, 4 }
  0x10   : > { %s239_s24 = scalar_lea.vmem %s677_s0, %s539_s21  ;;  %s249_s29 = scalar_lea.vmem %s680_s3, %s539_s21 }
  0x11   : > { %v261_v5 = vld [vmem:[%s239_s24] sm:$0xff]  ;;  %574 = vset.pattern.permute.xlu1 %v602_v1  ;;  %575 = vset.pattern.permute.xlu0 %v602_v1  ;;  %s259_s7 = scalar_lea.vmem %s681_s4, %s541_s30 }
  0x12   : > { %v262_v6 = vmul.f32 %v261_v5, %v261_v5  ;;  %382 = vperm.xlu1 %574, %v273_v7  }
  0x14   : > { %v263_v8 = vmul.f32 %v262_v6, %v261_v5 }
  0x16   : > { %v264_v9 = vmul.f32 0.044715, %v263_v8 }
  0x18   : > { %v265_v10 = vadd.f32 %v264_v9, %v261_v5 }
  0x1a   : > { %v266_v11 = vmul.f32 0.7978846, %v265_v10 }
  0x1c   : > { %576 = vtanh.f32 %v266_v11 }
  0x26   : > { %v577_v12 = vpop.eup %576 }
  0x27   : > { %v268_v13 = vadd.f32 1.0, %v577_v12 }
  0x29   : > { %v269_v14 = vmul.f32 0.5, %v268_v13 }
  0x2b   : > { %v270_v15 = vmul.f32 %v269_v14, %v261_v5 }
  0x2d   : > { %271 = vst [vmem:[%s249_s29] sm:$0xff] %v270_v15  ;;  %v283_v26 = vrot.slane %v270_v15, %v282_v18  ;;  %v287_v27 = vrot.slane %v270_v15, %v286_v19  ;;  %v309_v28 = vrot.slane %v270_v15, %v308_v20  ;;  %v313_v29 = vrot.slane %v270_v15, %v312_v21 }
  0x2e   : > { %v335_v30 = vrot.slane %v270_v15, %v334_v22  ;;  %v339_v31 = vrot.slane %v270_v15, %v338_v23  ;;  %v361_v34 = vrot.slane %v270_v15, %v360_v24  ;;  %v365_v35 = vrot.slane %v270_v15, %v364_v25 }
  0x2f   : > { %v293_v36 = vrot.slane %v283_v26, %v282_v18  ;;  %v297_v37 = vrot.slane %v287_v27, %v282_v18  ;;  %v319_v38 = vrot.slane %v309_v28, %v308_v20  ;;  %v323_v39 = vrot.slane %v313_v29, %v308_v20 }
  0x30   : > { %v345_v40 = vrot.slane %v335_v30, %v334_v22  ;;  %v349_v41 = vrot.slane %v339_v31, %v334_v22  ;;  %v371_v42 = vrot.slane %v361_v34, %v360_v24  ;;  %v375_v43 = vrot.slane %v365_v35, %v360_v24 }
  0x87   : > { %v277_v32 = vpop.permute.xlu0 %276  ;;  %v330_v33 = vpop.permute.xlu1 %329 }
  0x88   : > { %v298_v46 = vmul.f32 %v293_v36, %v277_v32  ;;  %v299_v47 = vmul.f32 %v297_v37, %v277_v32  ;;  %v350_v50 = vmul.f32 %v345_v40, %v330_v33  ;;  %v351_v51 = vmul.f32 %v349_v41, %v330_v33 }
  0x8c   : > { %v304_v44 = vpop.permute.xlu0 %303  ;;  %v356_v45 = vpop.permute.xlu1 %355 }
  0x8d   : > { %v324_v48 = vmul.f32 %v319_v38, %v304_v44  ;;  %v325_v49 = vmul.f32 %v323_v39, %v304_v44  ;;  %v376_v54 = vmul.f32 %v371_v42, %v356_v45  ;;  %v377_v55 = vmul.f32 %v375_v43, %v356_v45 }
  0x8f   : > { %v326_v52 = vadd.f32 %v324_v48, %v298_v46  ;;  %v327_v53 = vadd.f32 %v325_v49, %v299_v47 }
  0x91   : > { %v352_v56 = vadd.f32 %v350_v50, %v326_v52  ;;  %v353_v57 = vadd.f32 %v351_v51, %v327_v53  ;;  %v383_v58 = vpop.permute.xlu1 %382 }
  0x93   : > { %v378_v59 = vadd.f32 %v376_v54, %v352_v56  ;;  %v379_v60 = vadd.f32 %v377_v55, %v353_v57 }
  0x95   : > { %v385_v61 = vadd.f32 %v383_v58, %v378_v59  ;;  %v386_v62 = vadd.f32 %v383_v58, %v379_v60 }
  0x97   : > { %387 = vst [vmem:[%s259_s7] sm:$0xff] %v385_v61  ;;  %388 = vst [vmem:[%s259_s7 + $0x8] sm:$0xff] %v386_v62 }
  0x98 PF: > { %s15_s17 = sadd.s32 1, %s600_s17   ;;  %s682_s15 = smov %s596_s16 }
  0x99   : > { %p12_p5 = scmp.ge.s32.totalorder %s15_s17, 4   ;;  %s683_s16 = smov %s685_s18 }
  0x9b   :  { %14 = sbr.rel (!%p12_p5) target bundleno = 2 (0x2), region = 74 }

// kernel: _lambda_.6
= control target key start
LH: loop header
LB: loop body
LE: loop exit
PB: predicated region body
PF: predicated region fallthrough
CT: control target
= control target key end

     0   :  { %s490_s18 = smov 0   ;;  %s541_s0 = inlined_call_operand.vmem [shape: f32[2,4,32], index: 0, kind: input, shape index: {}]   ;;  %s542_s1 = inlined_call_operand.vmem [shape: f32[2,4,32], index: 1, kind: input, shape index: {}]   ;;  %s543_s2 = inlined_call_operand.vmem [shape: f32[4,8,32], index: 2, kind: input, shape index: {}]   ;;  %s544_s3 = inlined_call_operand.vmem [shape: f32[4,8,32], index: 3, kind: input, shape index: {}]   ;;  %s545_s4 = inlined_call_operand.vmem [shape: f32[2,8,32], index: 4, kind: output, shape index: {0}]   ;;  %s546_s5 = inlined_call_operand.vmem [shape: f32[2,8,32], index: 5, kind: output, shape index: {1}]  }
   0x1 LB: > { %s427_s19 = sadd.s32 4294967295, %s458_s18   ;;  %p431_p0 = scmp.ge.s32.totalorder %s458_s18, 1  ;;  %s458_s18 = sphi %s490_s18, %s16_s18  }
   0x2   : > { %p198_p1 = scmp.lt.s32.totalorder %s458_s18, 3 }
   0x4   : > { %p199_p2 = pnand %p431_p0, %p198_p1 }
   0x5   : > { %p232_p3 = scmp.lt.s32.totalorder (!%p199_p2), %s427_s19, 1  ;;  %v252_v0 = vlaneseq (!%p199_p2)  ;;  %v250_v5 = vld [vmem:[%s543_s2] sm:$0xff] (!%p199_p2)  ;;  %v436_v11 = vld [vmem:[%s543_s2 + $0x8] sm:$0xff] (!%p199_p2)  ;;  %v438_v23 = vld [vmem:[%s543_s2 + $0x10] sm:$0xff] (!%p199_p2)  ;;  %vm328_vm0 = vcmask (!%p199_p2), 261120  }
   0x6   : > { %202 = sbr.rel (%p199_p2) target bundleno = 37 (0x25), region = 36  ;;  %v251_v8 = vld [vmem:[%s544_s3] sm:$0xff] (!%p199_p2)  ;;  %v437_v12 = vld [vmem:[%s544_s3 + $0x8] sm:$0xff] (!%p199_p2)  ;;  %v439_v26 = vld [vmem:[%s544_s3 + $0x10] sm:$0xff] (!%p199_p2) }
   0x7   : > { %v253_v1 = vshrl.u32 (!%p199_p2), %v252_v0, 7  ;;  %v440_v33 = vld [vmem:[%s543_s2 + $0x18] sm:$0xff] (!%p199_p2) }
   0x8   : > { %v441_v38 = vld [vmem:[%s544_s3 + $0x18] sm:$0xff] (!%p199_p2) }
   0x9   : > { %v254_v2 = vsub.s32 (!%p199_p2), 0, %v253_v1  ;;  %v274_v3 = vsub.s32 (!%p199_p2), 1, %v253_v1  ;;  %v294_v4 = vsub.s32 (!%p199_p2), 2, %v253_v1  ;;  %v314_v16 = vsub.s32 (!%p199_p2), 3, %v253_v1 }
   0xd   : > { %s548_s19 = smov (!%p232_p3, %s427_s19), 1 }
   0xe   : > { %s432_s20 = sshll.u32 %s548_s19, 2 }
   0xf   : > { %s235_s23 = scalar_lea.vmem %s541_s0, %s432_s20  ;;  %s239_s26 = scalar_lea.vmem %s542_s1, %s432_s20 }
  0x10   : > { %v248_v6 = vld [vmem:[%s235_s23] sm:$0xf]  ;;  %s434_s20 = sshll.u32 %s548_s19, 3 }
  0x11   : > { %v249_v7 = vld [vmem:[%s239_s26] sm:$0xf]  ;;  %v255_v9 = vrot.slane %v248_v6, %v254_v2  ;;  %v275_v13 = vrot.slane %v248_v6, %v274_v3  ;;  %v295_v15 = vrot.slane %v248_v6, %v294_v4  ;;  %v315_v32 = vrot.slane %v248_v6, %v314_v16  ;;  %s243_s23 = scalar_lea.vmem %s545_s4, %s434_s20  ;;  %s247_s26 = scalar_lea.vmem %s546_s5, %s434_s20 }
  0x12   : > { %v261_v10 = vrot.slane %v249_v7, %v254_v2  ;;  %v281_v14 = vrot.slane %v249_v7, %v274_v3  ;;  %v301_v27 = vrot.slane %v249_v7, %v294_v4  ;;  %v321_v39 = vrot.slane %v249_v7, %v314_v16 }
  0x13   : > { %v256_v17 = vmul.f32 %v255_v9, %v250_v5  ;;  %v264_v19 = vmul.f32 %v255_v9, %v251_v8  ;;  %v276_v21 = vmul.f32 %v436_v11, %v275_v13  ;;  %v284_v22 = vmul.f32 %v437_v12, %v275_v13 }
  0x14   : > { %v262_v18 = vmul.f32 %v261_v10, %v251_v8  ;;  %v266_v20 = vmul.f32 %v261_v10, %v250_v5  ;;  %v282_v25 = vmul.f32 %v437_v12, %v281_v14  ;;  %v286_v29 = vmul.f32 %v436_v11, %v281_v14 }
  0x15   : > { %v296_v31 = vmul.f32 %v438_v23, %v295_v15  ;;  %v304_v35 = vmul.f32 %v439_v26, %v295_v15  ;;  %v302_v37 = vmul.f32 %v439_v26, %v301_v27  ;;  %v306_v41 = vmul.f32 %v438_v23, %v301_v27 }
  0x16   : > { %v263_v24 = vsub.f32 %v256_v17, %v262_v18  ;;  %v267_v28 = vadd.f32 %v266_v20, %v264_v19  ;;  %v316_v43 = vmul.f32 %v440_v33, %v315_v32  ;;  %v324_v45 = vmul.f32 %v441_v38, %v315_v32 }
  0x17   : > { %v322_v47 = vmul.f32 %v441_v38, %v321_v39  ;;  %v326_v49 = vmul.f32 %v440_v33, %v321_v39 }
  0x18   : > { %v277_v30 = vadd.f32 %v276_v21, %v263_v24  ;;  %v285_v34 = vadd.f32 %v284_v22, %v267_v28 }
  0x1a   : > { %v283_v36 = vsub.f32 %v277_v30, %v282_v25  ;;  %v287_v40 = vadd.f32 %v286_v29, %v285_v34 }
  0x1c   : > { %v297_v42 = vadd.f32 %v296_v31, %v283_v36  ;;  %v305_v44 = vadd.f32 %v304_v35, %v287_v40 }
  0x1e   : > { %v303_v46 = vsub.f32 %v297_v42, %v302_v37  ;;  %v307_v48 = vadd.f32 %v306_v41, %v305_v44 }
  0x20   : > { %v317_v50 = vadd.f32 %v316_v43, %v303_v46  ;;  %v325_v51 = vadd.f32 %v324_v45, %v307_v48 }
  0x22   : > { %v323_v52 = vsub.f32 %v317_v50, %v322_v47  ;;  %v327_v53 = vadd.f32 %v326_v49, %v325_v51 }
  0x24   : > { %329 = vst.msk [vmem:[%s243_s23] sm:$0xff] %vm328_vm0, %v323_v52  ;;  %330 = vst.msk [vmem:[%s247_s26] sm:$0xff] %vm328_vm0, %v327_v53 }
  0x25 PF: > { %s16_s18 = sadd.s32 1, %s458_s18  }
  0x26   : > { %p13_p4 = scmp.ge.s32.totalorder %s16_s18, 4  }
  0x28   :  { %15 = sbr.rel (!%p13_p4) target bundleno = 1 (0x1), region = 87 }

// kernel: reverse.5
= control target key start
LH: loop header
LB: loop body
LE: loop exit
PB: predicated region body
PF: predicated region fallthrough
CT: control target
= control target key end

     0   :  { %v103_v3 = vlaneseq  ;;  %v96_v18 = vld [vmem:[#allocation0 + $0x7] ss:$-1 sm:$0xff]  ;;  %v110_v19 = vld [vmem:[#allocation0 + $0x17] ss:$-1 sm:$0xff]  ;;  %s604_s0 = inlined_call_operand.vmem [shape: f32[2,8,16,7], index: 0, kind: input, shape index: {}]   ;;  %s605_s1 = inlined_call_operand.vmem [shape: f32[2,8,16,7], index: 1, kind: output, shape index: {}]  }
   0x1   :  { %v60_v0 = vld [vmem:[%s604_s0] sm:$0xff]  ;;  %v62_v1 = vld [vmem:[%s604_s0 + $0x8] sm:$0xff]  ;;  %v64_v2 = vld [vmem:[%s604_s0 + $0x10] sm:$0xff]  ;;  %v97_v20 = vrot.slane %v96_v18, 1  ;;  %v111_v21 = vrot.slane %v110_v19, 1 }
   0x2   :  { %61 = vst [vmem:[#allocation0 + $0x8] sm:$0xff] %v60_v0  ;;  %63 = vst [vmem:[#allocation0 + $0x18] sm:$0xff] %v62_v1  ;;  %v66_v4 = vld [vmem:[%s604_s0 + $0x18] sm:$0xff]  ;;  %v68_v5 = vld [vmem:[%s604_s0 + $0x20] sm:$0xff]  ;;  %v500_v10 = vshrl.u32 %v103_v3, 7 }
   0x3   :  { %65 = vst [vmem:[#allocation0 + $0x28] sm:$0xff] %v64_v2  ;;  %v70_v6 = vld [vmem:[%s604_s0 + $0x28] sm:$0xff]  ;;  %67 = vst [vmem:[#allocation0 + $0x38] sm:$0xff] %v66_v4  ;;  %v72_v7 = vld [vmem:[%s604_s0 + $0x30] sm:$0xff] }
   0x4   :  { %69 = vst [vmem:[#allocation0 + $0x48] sm:$0xff] %v68_v5  ;;  %71 = vst [vmem:[#allocation0 + $0x58] sm:$0xff] %v70_v6  ;;  %v74_v8 = vld [vmem:[%s604_s0 + $0x38] sm:$0xff]  ;;  %v76_v9 = vld [vmem:[%s604_s0 + $0x40] sm:$0xff]  ;;  %vm105_vm0 = vcmp.lt.s32.totalorder %v500_v10, 7 }
   0x5   :  { %73 = vst [vmem:[#allocation0 + $0x68] sm:$0xff] %v72_v7  ;;  %75 = vst [vmem:[#allocation0 + $0x78] sm:$0xff] %v74_v8  ;;  %v78_v11 = vld [vmem:[%s604_s0 + $0x48] sm:$0xff]  ;;  %v80_v12 = vld [vmem:[%s604_s0 + $0x50] sm:$0xff] }
   0x6   :  { %77 = vst [vmem:[#allocation0 + $0x88] sm:$0xff] %v76_v9  ;;  %v82_v13 = vld [vmem:[%s604_s0 + $0x58] sm:$0xff]  ;;  %79 = vst [vmem:[#allocation0 + $0x98] sm:$0xff] %v78_v11  ;;  %v84_v14 = vld [vmem:[%s604_s0 + $0x60] sm:$0xff] }
   0x7   :  { %81 = vst [vmem:[#allocation0 + $0xa8] sm:$0xff] %v80_v12  ;;  %83 = vst [vmem:[#allocation0 + $0xb8] sm:$0xff] %v82_v13  ;;  %v86_v15 = vld [vmem:[%s604_s0 + $0x68] sm:$0xff]  ;;  %v88_v16 = vld [vmem:[%s604_s0 + $0x70] sm:$0xff] }
   0x8   :  { %85 = vst [vmem:[#allocation0 + $0xc8] sm:$0xff] %v84_v14  ;;  %87 = vst [vmem:[#allocation0 + $0xd8] sm:$0xff] %v86_v15  ;;  %v90_v17 = vld [vmem:[%s604_s0 + $0x78] sm:$0xff]  ;;  %v124_v22 = vld [vmem:[#allocation0 + $0x27] ss:$-1 sm:$0xff] }
   0x9   :  { %89 = vst [vmem:[#allocation0 + $0xe8] sm:$0xff] %v88_v16  ;;  %91 = vst [vmem:[#allocation0 + $0xf8] sm:$0xff] %v90_v17  ;;  %v138_v23 = vld [vmem:[#allocation0 + $0x37] ss:$-1 sm:$0xff]  ;;  %v125_v24 = vrot.slane %v124_v22, 1 }
   0xa   :  { %v139_v25 = vrot.slane %v138_v23, 1  ;;  %v152_v26 = vld [vmem:[#allocation0 + $0x47] ss:$-1 sm:$0xff]  ;;  %v166_v27 = vld [vmem:[#allocation0 + $0x57] ss:$-1 sm:$0xff]  ;;  %98 = vst [vmem:[#allocation1] sm:$0xff] %v97_v20 }
   0xb   :  { %v101_v28 = vld [vmem:[#allocation0 + $0xf] ss:$-1 sm:$0xff]  ;;  %112 = vst [vmem:[#allocation1 + $0x8] sm:$0xff] %v111_v21  ;;  %v115_v29 = vld [vmem:[#allocation0 + $0x1f] ss:$-1 sm:$0xff]  ;;  %126 = vst [vmem:[#allocation1 + $0x10] sm:$0xff] %v125_v24 }
   0xc   :  { %v129_v30 = vld [vmem:[#allocation0 + $0x2f] ss:$-1 sm:$0xff]  ;;  %v102_v31 = vrot.slane %v101_v28, 1  ;;  %v116_v32 = vrot.slane %v115_v29, 1  ;;  %140 = vst [vmem:[#allocation1 + $0x18] sm:$0xff] %v139_v25  ;;  %v153_v35 = vrot.slane %v152_v26, 1 }
   0xd   :  { %v130_v33 = vrot.slane %v129_v30, 1  ;;  %v143_v34 = vld [vmem:[#allocation0 + $0x3f] ss:$-1 sm:$0xff]  ;;  %v157_v37 = vld [vmem:[#allocation0 + $0x4f] ss:$-1 sm:$0xff]  ;;  %v167_v38 = vrot.slane %v166_v27, 1 }
   0xe   :  { %v144_v36 = vrot.slane %v143_v34, 1  ;;  %v171_v39 = vld [vmem:[#allocation0 + $0x5f] ss:$-1 sm:$0xff]  ;;  %106 = vst.msk [vmem:[#allocation1] sm:$0xff] %vm105_vm0, %v102_v31  ;;  %120 = vst.msk [vmem:[#allocation1 + $0x8] sm:$0xff] %vm105_vm0, %v116_v32  ;;  %v158_v40 = vrot.slane %v157_v37, 1 }
   0xf   :  { %134 = vst.msk [vmem:[#allocation1 + $0x10] sm:$0xff] %vm105_vm0, %v130_v33  ;;  %154 = vst [vmem:[#allocation1 + $0x20] sm:$0xff] %v153_v35  ;;  %v172_v41 = vrot.slane %v171_v39, 1  ;;  %v180_v42 = vld [vmem:[#allocation0 + $0x67] ss:$-1 sm:$0xff] }
  0x10   :  { %v185_v43 = vld [vmem:[#allocation0 + $0x6f] ss:$-1 sm:$0xff]  ;;  %148 = vst.msk [vmem:[#allocation1 + $0x18] sm:$0xff] %vm105_vm0, %v144_v36  ;;  %168 = vst [vmem:[#allocation1 + $0x28] sm:$0xff] %v167_v38  ;;  %v181_v44 = vrot.slane %v180_v42, 1 }
  0x11   :  { %v186_v45 = vrot.slane %v185_v43, 1  ;;  %v194_v46 = vld [vmem:[#allocation0 + $0x77] ss:$-1 sm:$0xff]  ;;  %v199_v47 = vld [vmem:[#allocation0 + $0x7f] ss:$-1 sm:$0xff]  ;;  %162 = vst.msk [vmem:[#allocation1 + $0x20] sm:$0xff] %vm105_vm0, %v158_v40 }
  0x12   :  { %176 = vst.msk [vmem:[#allocation1 + $0x28] sm:$0xff] %vm105_vm0, %v172_v41  ;;  %v195_v48 = vrot.slane %v194_v46, 1  ;;  %v200_v49 = vrot.slane %v199_v47, 1  ;;  %v208_v50 = vld [vmem:[#allocation0 + $0x87] ss:$-1 sm:$0xff]  ;;  %182 = vst [vmem:[#allocation1 + $0x30] sm:$0xff] %v181_v44 }
  0x13   :  { %v213_v51 = vld [vmem:[#allocation0 + $0x8f] ss:$-1 sm:$0xff]  ;;  %v209_v52 = vrot.slane %v208_v50, 1  ;;  %v222_v54 = vld [vmem:[#allocation0 + $0x97] ss:$-1 sm:$0xff]  ;;  %190 = vst.msk [vmem:[#allocation1 + $0x30] sm:$0xff] %vm105_vm0, %v186_v45 }
  0x14   :  { %v214_v53 = vrot.slane %v213_v51, 1  ;;  %v227_v55 = vld [vmem:[#allocation0 + $0x9f] ss:$-1 sm:$0xff]  ;;  %196 = vst [vmem:[#allocation1 + $0x38] sm:$0xff] %v195_v48  ;;  %v223_v56 = vrot.slane %v222_v54, 1 }
  0x15   :  { %v228_v57 = vrot.slane %v227_v55, 1  ;;  %v236_v58 = vld [vmem:[#allocation0 + $0xa7] ss:$-1 sm:$0xff]  ;;  %v241_v59 = vld [vmem:[#allocation0 + $0xaf] ss:$-1 sm:$0xff]  ;;  %204 = vst.msk [vmem:[#allocation1 + $0x38] sm:$0xff] %vm105_vm0, %v200_v49 }
  0x16   :  { %210 = vst [vmem:[#allocation1 + $0x40] sm:$0xff] %v209_v52  ;;  %v237_v60 = vrot.slane %v236_v58, 1  ;;  %v242_v61 = vrot.slane %v241_v59, 1  ;;  %v250_v62 = vld [vmem:[#allocation0 + $0xb7] ss:$-1 sm:$0xff]  ;;  %224 = vst [vmem:[#allocation1 + $0x48] sm:$0xff] %v223_v56 }
  0x17   :  { %v255_v63 = vld [vmem:[#allocation0 + $0xbf] ss:$-1 sm:$0xff]  ;;  %218 = vst.msk [vmem:[#allocation1 + $0x40] sm:$0xff] %vm105_vm0, %v214_v53  ;;  %v251_v0 = vrot.slane %v250_v62, 1  ;;  %v264_v2 = vld [vmem:[#allocation0 + $0xc7] ss:$-1 sm:$0xff] }
  0x18   :  { %v256_v1 = vrot.slane %v255_v63, 1  ;;  %v269_v3 = vld [vmem:[#allocation0 + $0xcf] ss:$-1 sm:$0xff]  ;;  %232 = vst.msk [vmem:[#allocation1 + $0x48] sm:$0xff] %vm105_vm0, %v228_v57  ;;  %238 = vst [vmem:[#allocation1 + $0x50] sm:$0xff] %v237_v60  ;;  %v265_v4 = vrot.slane %v264_v2, 1 }
  0x19   :  { %v270_v5 = vrot.slane %v269_v3, 1  ;;  %v278_v6 = vld [vmem:[#allocation0 + $0xd7] ss:$-1 sm:$0xff]  ;;  %v283_v7 = vld [vmem:[#allocation0 + $0xdf] ss:$-1 sm:$0xff]  ;;  %246 = vst.msk [vmem:[#allocation1 + $0x50] sm:$0xff] %vm105_vm0, %v242_v61 }
  0x1a   :  { %252 = vst [vmem:[#allocation1 + $0x58] sm:$0xff] %v251_v0  ;;  %v279_v8 = vrot.slane %v278_v6, 1  ;;  %v284_v9 = vrot.slane %v283_v7, 1  ;;  %v292_v11 = vld [vmem:[#allocation0 + $0xe7] ss:$-1 sm:$0xff]  ;;  %266 = vst [vmem:[#allocation1 + $0x60] sm:$0xff] %v265_v4 }
  0x1b   :  { %v297_v12 = vld [vmem:[#allocation0 + $0xef] ss:$-1 sm:$0xff]  ;;  %260 = vst.msk [vmem:[#allocation1 + $0x58] sm:$0xff] %vm105_vm0, %v256_v1  ;;  %v293_v13 = vrot.slane %v292_v11, 1  ;;  %v306_v15 = vld [vmem:[#allocation0 + $0xf7] ss:$-1 sm:$0xff] }
  0x1c   :  { %v298_v14 = vrot.slane %v297_v12, 1  ;;  %v311_v16 = vld [vmem:[#allocation0 + $0xff] ss:$-1 sm:$0xff]  ;;  %274 = vst.msk [vmem:[#allocation1 + $0x60] sm:$0xff] %vm105_vm0, %v270_v5  ;;  %280 = vst [vmem:[#allocation1 + $0x68] sm:$0xff] %v279_v8  ;;  %v307_v17 = vrot.slane %v306_v15, 1 }
  0x1d   :  { %v312_v18 = vrot.slane %v311_v16, 1  ;;  %v374_v19 = vld [vmem:[#allocation1] sm:$0xff]  ;;  %v376_v20 = vld [vmem:[#allocation1 + $0x8] sm:$0xff]  ;;  %v378_v21 = vld [vmem:[#allocation1 + $0x10] sm:$0xff]  ;;  %288 = vst.msk [vmem:[#allocation1 + $0x68] sm:$0xff] %vm105_vm0, %v284_v9 }
  0x1e   :  { %294 = vst [vmem:[#allocation1 + $0x70] sm:$0xff] %v293_v13  ;;  %375 = vst [vmem:[%s605_s1] sm:$0xff] %v374_v19  ;;  %v380_v22 = vld [vmem:[#allocation1 + $0x18] sm:$0xff]  ;;  %v382_v23 = vld [vmem:[#allocation1 + $0x20] sm:$0xff] }
  0x1f   :  { %377 = vst [vmem:[%s605_s1 + $0x8] sm:$0xff] %v376_v20  ;;  %379 = vst [vmem:[%s605_s1 + $0x10] sm:$0xff] %v378_v21  ;;  %v384_v24 = vld [vmem:[#allocation1 + $0x28] sm:$0xff]  ;;  %v386_v25 = vld [vmem:[#allocation1 + $0x30] sm:$0xff] }
  0x20   :  { %302 = vst.msk [vmem:[#allocation1 + $0x70] sm:$0xff] %vm105_vm0, %v298_v14  ;;  %308 = vst [vmem:[#allocation1 + $0x78] sm:$0xff] %v307_v17  ;;  %v388_v26 = vld [vmem:[#allocation1 + $0x38] sm:$0xff]  ;;  %v390_v10 = vld [vmem:[#allocation1 + $0x40] sm:$0xff] }
  0x21   :  { %381 = vst [vmem:[%s605_s1 + $0x18] sm:$0xff] %v380_v22  ;;  %383 = vst [vmem:[%s605_s1 + $0x20] sm:$0xff] %v382_v23  ;;  %v392_v27 = vld [vmem:[#allocation1 + $0x48] sm:$0xff]  ;;  %v394_v28 = vld [vmem:[#allocation1 + $0x50] sm:$0xff] }
  0x22   :  { %385 = vst [vmem:[%s605_s1 + $0x28] sm:$0xff] %v384_v24  ;;  %316 = vst.msk [vmem:[#allocation1 + $0x78] sm:$0xff] %vm105_vm0, %v312_v18  ;;  %v396_v29 = vld [vmem:[#allocation1 + $0x58] sm:$0xff] }
  0x23   :  { %387 = vst [vmem:[%s605_s1 + $0x30] sm:$0xff] %v386_v25  ;;  %389 = vst [vmem:[%s605_s1 + $0x38] sm:$0xff] %v388_v26  ;;  %v398_v30 = vld [vmem:[#allocation1 + $0x60] sm:$0xff] }
  0x24   :  { %391 = vst [vmem:[%s605_s1 + $0x40] sm:$0xff] %v390_v10  ;;  %393 = vst [vmem:[%s605_s1 + $0x48] sm:$0xff] %v392_v27  ;;  %v400_v31 = vld [vmem:[#allocation1 + $0x68] sm:$0xff] }
  0x25   :  { %395 = vst [vmem:[%s605_s1 + $0x50] sm:$0xff] %v394_v28  ;;  %397 = vst [vmem:[%s605_s1 + $0x58] sm:$0xff] %v396_v29 }
  0x26   :  { %399 = vst [vmem:[%s605_s1 + $0x60] sm:$0xff] %v398_v30  ;;  %401 = vst [vmem:[%s605_s1 + $0x68] sm:$0xff] %v400_v31 }
  0x27   :  { %v402_v32 = vld [vmem:[#allocation1 + $0x70] sm:$0xff] }
  0x28   :  { %403 = vst [vmem:[%s605_s1 + $0x70] sm:$0xff] %v402_v32 }
  0x29   :  { %v404_v33 = vld [vmem:[#allocation1 + $0x78] sm:$0xff] }
  0x2a   :  { %405 = vst [vmem:[%s605_s1 + $0x78] sm:$0xff] %v404_v33 }

// kernel: _lambda_.7
= control target key start
LH: loop header
LB: loop body
LE: loop exit
PB: predicated region body
PF: predicated region fallthrough
CT: control target
= control target key end

     0   :  { %s771_s18 = smov 0   ;;  %s773_s19 = smov 0   ;;  %s822_s0 = inlined_call_operand.vmem [shape: f32[2,8,256], index: 0, kind: input, shape index: {}]   ;;  %s823_s1 = inlined_call_operand.vmem [shape: f32[2,8,256], index: 1, kind: input, shape index: {}]   ;;  %s824_s2 = inlined_call_operand.vmem [shape: f32[8,8], index: 2, kind: input, shape index: {}]   ;;  %s825_s3 = inlined_call_operand.vmem [shape: f32[8,1], index: 3, kind: input, shape index: {}]   ;;  %s826_s4 = inlined_call_operand.vmem [shape: f32[2,8,256], index: 4, kind: output, shape index: {0}]   ;;  %s827_s5 = inlined_call_operand.vmem [shape: f32[2,8,256], index: 5, kind: output, shape index: {1}]  }
   0x1   :  { %s775_s20 = smov 0  }
   0x2 LB: > { %s28_s21 = sadd.s32 1, %s727_s19  ;;  %p649_p0 = scmp.ge.s32.totalorder %s731_s20, 1  ;;  %s731_s20 = sphi %s775_s20, %s16_s20   ;;  %s727_s19 = sphi %s773_s19, %s829_s19   ;;  %s723_s18 = sphi %s771_s18, %s828_s18  }
   0x3   : > { %p30_p1 = scmp.ge.s32.totalorder %s28_s21, 2  ;;  %p230_p2 = scmp.lt.s32.totalorder %s731_s20, 3 }
   0x5   : > { %s831_s21 = smov (%p30_p1, %s28_s21), 0  ;;  %p231_p3 = pnand %p649_p0, %p230_p2 }
   0x6   : > { %v350_v0 = vld [vmem:[%s824_s2] sm:$0xff] (!%p231_p3)  ;;  %v733_v1 = vmov (!%p231_p3), 2   ;;  %v734_v2 = vmov (!%p231_p3), 0   ;;  %p285_p4 = scmp.lt.s32.totalorder (!%p231_p3), %s723_s18, 1  ;;  %v735_v3 = vmov (!%p231_p3), 3   ;;  %v736_v4 = vmov (!%p231_p3), 1  }
   0x7   : > { %234 = sbr.rel (%p231_p3) target bundleno = 163 (0xa3), region = 36  ;;  %698 = vset.pattern.permute.xlu1 (!%p231_p3), %v733_v1  ;;  %696 = vset.pattern.permute.xlu0 (!%p231_p3), %v734_v2  ;;  %v737_v12 = vmov (!%p231_p3), 4   ;;  %v738_v13 = vmov (!%p231_p3), 5   ;;  %v351_v17 = vld [vmem:[%s825_s3] sm:$0xff] (!%p231_p3)  ;;  %v739_v20 = vmov (!%p231_p3), 6   ;;  %v740_v25 = vmov (!%p231_p3), 7  }
   0x8   : > { %386 = vperm.xlu1 (!%p231_p3), %698, %v350_v0   ;;  %354 = vperm.xlu0 (!%p231_p3), %696, %v350_v0   ;;  %v357_v34 = vlaneseq (!%p231_p3) }
   0xa   : > { %v358_v35 = vshrl.u32 (!%p231_p3), %v357_v34, 7 }
   0xc   : > { %699 = vset.pattern.permute.xlu1 (!%p231_p3), %v735_v3  ;;  %697 = vset.pattern.permute.xlu0 (!%p231_p3), %v736_v4  ;;  %v359_v36 = vsub.s32 (!%p231_p3), 0, %v358_v35  ;;  %v375_v37 = vsub.s32 (!%p231_p3), 1, %v358_v35  ;;  %v391_v38 = vsub.s32 (!%p231_p3), 2, %v358_v35  ;;  %v407_v41 = vsub.s32 (!%p231_p3), 3, %v358_v35 }
   0xd   : > { %402 = vperm.xlu1 (!%p231_p3), %699, %v350_v0   ;;  %370 = vperm.xlu0 (!%p231_p3), %697, %v350_v0   ;;  %v423_v46 = vsub.s32 (!%p231_p3), 4, %v358_v35  ;;  %v439_v53 = vsub.s32 (!%p231_p3), 5, %v358_v35 }
   0xe   : > { %s833_s18 = smov (!%p285_p4, %s723_s18), 1 }
   0xf   : > { %s792_s24 = sshll.u32 %s833_s18, 4 }
  0x10   : > { %s292_s27 = scalar_lea.vmem %s822_s0, %s792_s24  ;;  %s302_s30 = scalar_lea.vmem %s823_s1, %s792_s24 }
  0x11   : > { %v324_v5 = vld [vmem:[%s292_s27] sm:$0xff]  ;;  %v325_v6 = vld [vmem:[%s292_s27 + $0x8] sm:$0xff]  ;;  %700 = vset.pattern.permute.xlu1 %v737_v12  ;;  %701 = vset.pattern.permute.xlu0 %v738_v13  ;;  %s312_s10 = scalar_lea.vmem %s826_s4, %s792_s24  ;;  %v471_v13 = vsub.s32 7, %v358_v35  ;;  %s322_s13 = scalar_lea.vmem %s827_s5, %s792_s24 }
  0x12   : > { %v326_v7 = vld [vmem:[%s302_s30] sm:$0xff]  ;;  %v327_v8 = vld [vmem:[%s302_s30 + $0x8] sm:$0xff]  ;;  %418 = vperm.xlu1 %700, %v350_v0   ;;  %434 = vperm.xlu0 %701, %v350_v0  }
  0x13   : > { %v328_v9 = vadd.f32 %v326_v7, %v324_v5  ;;  %v329_v10 = vadd.f32 %v327_v8, %v325_v6 }
  0x15   : > { %v330_v11 = vmul.f32 %v328_v9, %v328_v9  ;;  %v331_v14 = vmul.f32 %v329_v10, %v329_v10 }
  0x16   : > { %702 = vset.pattern.permute.xlu1 %v739_v20  ;;  %704 = vset.pattern.permute.xlu0 %v734_v2  ;;  %v455_v2 = vsub.s32 6, %v358_v35 }
  0x17   : > { %v332_v15 = vmul.f32 %v330_v11, %v328_v9  ;;  %v333_v16 = vmul.f32 %v331_v14, %v329_v10  ;;  %450 = vperm.xlu1 %702, %v350_v0   ;;  %483 = vperm.xlu0 %704, %v351_v17  }
  0x19   : > { %v334_v18 = vmul.f32 0.044715, %v332_v15  ;;  %v335_v19 = vmul.f32 0.044715, %v333_v16 }
  0x1b   : > { %v336_v21 = vadd.f32 %v334_v18, %v328_v9  ;;  %v337_v22 = vadd.f32 %v335_v19, %v329_v10  ;;  %703 = vset.pattern.permute.xlu1 %v740_v25 }
  0x1c   : > { %466 = vperm.xlu1 %703, %v350_v0  }
  0x1d   : > { %v338_v23 = vmul.f32 0.7978846, %v336_v21  ;;  %v339_v24 = vmul.f32 0.7978846, %v337_v22 }
  0x1f   : > { %705 = vtanh.f32 %v338_v23 }
  0x20   : > { %707 = vtanh.f32 %v339_v24 }
  0x29   : > { %v706_v26 = vpop.eup %705 }
  0x2a   : > { %v708_v27 = vpop.eup %707  ;;  %v342_v28 = vadd.f32 1.0, %v706_v26 }
  0x2b   : > { %v343_v29 = vadd.f32 1.0, %v708_v27 }
  0x2c   : > { %v344_v30 = vmul.f32 0.5, %v342_v28 }
  0x2d   : > { %v345_v31 = vmul.f32 0.5, %v343_v29 }
  0x2e   : > { %v346_v32 = vmul.f32 %v344_v30, %v328_v9 }
  0x2f   : > { %v347_v33 = vmul.f32 %v345_v31, %v329_v10 }
  0x30   : > { %348 = vst [vmem:[%s312_s10] sm:$0xff] %v346_v32  ;;  %v360_v42 = vrot.slane %v346_v32, %v359_v36  ;;  %v376_v44 = vrot.slane %v346_v32, %v375_v37  ;;  %v392_v47 = vrot.slane %v346_v32, %v391_v38  ;;  %v408_v50 = vrot.slane %v346_v32, %v407_v41 }
  0x31   : > { %349 = vst [vmem:[%s312_s10 + $0x8] sm:$0xff] %v347_v33  ;;  %v364_v43 = vrot.slane %v347_v33, %v359_v36  ;;  %v380_v45 = vrot.slane %v347_v33, %v375_v37  ;;  %v396_v48 = vrot.slane %v347_v33, %v391_v38  ;;  %v412_v51 = vrot.slane %v347_v33, %v407_v41 }
  0x32   : > { %v424_v58 = vrot.slane %v346_v32, %v423_v46  ;;  %v428_v59 = vrot.slane %v347_v33, %v423_v46  ;;  %v440_v0 = vrot.slane %v346_v32, %v439_v53  ;;  %v444_v1 = vrot.slane %v347_v33, %v439_v53 }
  0x33   : > { %v456_v16 = vrot.slane %v346_v32, %v455_v2  ;;  %v460_v17 = vrot.slane %v347_v33, %v455_v2  ;;  %v472_v21 = vrot.slane %v346_v32, %v471_v13  ;;  %v476_v22 = vrot.slane %v347_v33, %v471_v13 }
  0x87   : > { %v387_v39 = vpop.permute.xlu1 %386  ;;  %v355_v40 = vpop.permute.xlu0 %354 }
  0x88   : > { %v365_v54 = vmul.f32 %v360_v42, %v355_v40  ;;  %v366_v55 = vmul.f32 %v364_v43, %v355_v40  ;;  %v397_v60 = vmul.f32 %v392_v47, %v387_v39  ;;  %v398_v61 = vmul.f32 %v396_v48, %v387_v39 }
  0x8c   : > { %v403_v49 = vpop.permute.xlu1 %402  ;;  %v371_v52 = vpop.permute.xlu0 %370 }
  0x8d   : > { %v381_v56 = vmul.f32 %v376_v44, %v371_v52  ;;  %v382_v57 = vmul.f32 %v380_v45, %v371_v52  ;;  %v413_v3 = vmul.f32 %v408_v50, %v403_v49  ;;  %v414_v4 = vmul.f32 %v412_v51, %v403_v49 }
  0x8f   : > { %v383_v62 = vadd.f32 %v381_v56, %v365_v54  ;;  %v384_v63 = vadd.f32 %v382_v57, %v366_v55 }
  0x91   : > { %v399_v5 = vadd.f32 %v397_v60, %v383_v62  ;;  %v400_v6 = vadd.f32 %v398_v61, %v384_v63  ;;  %v419_v7 = vpop.permute.xlu1 %418  ;;  %v435_v8 = vpop.permute.xlu0 %434 }
  0x92   : > { %v429_v9 = vmul.f32 %v424_v58, %v419_v7  ;;  %v430_v10 = vmul.f32 %v428_v59, %v419_v7  ;;  %v445_v14 = vmul.f32 %v440_v0, %v435_v8  ;;  %v446_v15 = vmul.f32 %v444_v1, %v435_v8 }
  0x93   : > { %v415_v11 = vadd.f32 %v413_v3, %v399_v5  ;;  %v416_v12 = vadd.f32 %v414_v4, %v400_v6 }
  0x95   : > { %v431_v18 = vadd.f32 %v429_v9, %v415_v11  ;;  %v432_v19 = vadd.f32 %v430_v10, %v416_v12 }
  0x96   : > { %v451_v20 = vpop.permute.xlu1 %450  ;;  %v484_v34 = vpop.permute.xlu0 %483 }
  0x97   : > { %v447_v23 = vadd.f32 %v445_v14, %v431_v18  ;;  %v448_v24 = vadd.f32 %v446_v15, %v432_v19  ;;  %v461_v25 = vmul.f32 %v456_v16, %v451_v20  ;;  %v462_v26 = vmul.f32 %v460_v17, %v451_v20 }
  0x99   : > { %v463_v28 = vadd.f32 %v461_v25, %v447_v23  ;;  %v464_v29 = vadd.f32 %v462_v26, %v448_v24 }
  0x9b   : > { %v467_v27 = vpop.permute.xlu1 %466 }
  0x9c   : > { %v477_v30 = vmul.f32 %v472_v21, %v467_v27  ;;  %v478_v31 = vmul.f32 %v476_v22, %v467_v27 }
  0x9e   : > { %v479_v35 = vadd.f32 %v477_v30, %v463_v28  ;;  %v480_v36 = vadd.f32 %v478_v31, %v464_v29 }
  0xa0   : > { %v486_v37 = vadd.f32 %v484_v34, %v479_v35  ;;  %v487_v38 = vadd.f32 %v484_v34, %v480_v36 }
  0xa2   : > { %488 = vst [vmem:[%s322_s13] sm:$0xff] %v486_v37  ;;  %489 = vst [vmem:[%s322_s13 + $0x8] sm:$0xff] %v487_v38 }
  0xa3 PF: > { %s16_s20 = sadd.s32 1, %s731_s20   ;;  %s828_s18 = smov %s727_s19 }
  0xa4   : > { %p13_p5 = scmp.ge.s32.totalorder %s16_s20, 4   ;;  %s829_s19 = smov %s831_s21 }
  0xa6   :  { %15 = sbr.rel (!%p13_p5) target bundleno = 2 (0x2), region = 81 }

// kernel: _lambda_.9
= control target key start
LH: loop header
LB: loop body
LE: loop exit
PB: predicated region body
PF: predicated region fallthrough
CT: control target
= control target key end

     0   :  { %s696_s18 = smov 0   ;;  %s698_s19 = smov 0   ;;  %s746_s0 = inlined_call_operand.vmem [shape: f32[2,8,256], index: 0, kind: input, shape index: {}]   ;;  %s747_s1 = inlined_call_operand.vmem [shape: f32[2,8,256], index: 1, kind: input, shape index: {}]   ;;  %s748_s2 = inlined_call_operand.vmem [shape: f32[2,4,256], index: 2, kind: input, shape index: {}]   ;;  %s749_s3 = inlined_call_operand.vmem [shape: f32[8,4], index: 3, kind: input, shape index: {}]   ;;  %s750_s4 = inlined_call_operand.vmem [shape: f32[8,1], index: 4, kind: input, shape index: {}]   ;;  %s751_s5 = inlined_call_operand.vmem [shape: f32[2,8,256], index: 5, kind: output, shape index: {}]  }
   0x1   :  { %s700_s20 = smov 0  }
   0x2 LB: > { %s27_s21 = sadd.s32 1, %s656_s19  ;;  %p589_p0 = scmp.ge.s32.totalorder %s660_s20, 1  ;;  %s660_s20 = sphi %s700_s20, %s15_s20   ;;  %s656_s19 = sphi %s698_s19, %s753_s19   ;;  %s652_s18 = sphi %s696_s18, %s752_s18  }
   0x3   : > { %p29_p1 = scmp.ge.s32.totalorder %s27_s21, 2  ;;  %p242_p2 = scmp.lt.s32.totalorder %s660_s20, 3 }
   0x5   : > { %s755_s21 = smov (%p29_p1, %s27_s21), 0  ;;  %p243_p3 = pnand %p589_p0, %p242_p2 }
   0x6   : > { %v343_v0 = vld [vmem:[%s749_s3] sm:$0xff] (!%p243_p3)  ;;  %v662_v1 = vmov (!%p243_p3), 0   ;;  %v663_v2 = vmov (!%p243_p3), 2   ;;  %v664_v3 = vmov (!%p243_p3), 1   ;;  %v665_v4 = vmov (!%p243_p3), 3   ;;  %p297_p4 = scmp.lt.s32.totalorder (!%p243_p3), %s652_s18, 1 }
   0x7   : > { %246 = sbr.rel (%p243_p3) target bundleno = 154 (0x9a), region = 40  ;;  %632 = vset.pattern.permute.xlu0 (!%p243_p3), %v662_v1  ;;  %634 = vset.pattern.permute.xlu1 (!%p243_p3), %v663_v2  ;;  %v344_v5 = vld [vmem:[%s750_s4] sm:$0xff] (!%p243_p3)  ;;  %v351_v6 = vlaneseq (!%p243_p3) }
   0x8   : > { %347 = vperm.xlu0 (!%p243_p3), %632, %v343_v0   ;;  %400 = vperm.xlu1 (!%p243_p3), %634, %v343_v0  }
   0x9   : > { %v352_v7 = vshrl.u32 (!%p243_p3), %v351_v6, 7 }
   0xb   : > { %v353_v8 = vsub.s32 (!%p243_p3), 0, %v352_v7  ;;  %v357_v9 = vsub.s32 (!%p243_p3), 4, %v352_v7  ;;  %v379_v10 = vsub.s32 (!%p243_p3), 1, %v352_v7  ;;  %v383_v11 = vsub.s32 (!%p243_p3), 5, %v352_v7 }
   0xc   : > { %633 = vset.pattern.permute.xlu0 (!%p243_p3), %v664_v3  ;;  %635 = vset.pattern.permute.xlu1 (!%p243_p3), %v665_v4  ;;  %v405_v13 = vsub.s32 (!%p243_p3), 2, %v352_v7  ;;  %v409_v14 = vsub.s32 (!%p243_p3), 6, %v352_v7  ;;  %v431_v15 = vsub.s32 (!%p243_p3), 3, %v352_v7  ;;  %v435_v16 = vsub.s32 (!%p243_p3), 7, %v352_v7 }
   0xd   : > { %374 = vperm.xlu0 (!%p243_p3), %633, %v343_v0   ;;  %426 = vperm.xlu1 (!%p243_p3), %635, %v343_v0  }
   0xe   : > { %s757_s18 = smov (!%p297_p4, %s652_s18), 1 }
   0xf   : > { %s602_s26 = sshll.u32 %s757_s18, 3  ;;  %s723_s30 = sshll.u32 %s757_s18, 4 }
  0x10   : > { %s324_s29 = scalar_lea.vmem %s748_s2, %s602_s26  ;;  %s304_s8 = scalar_lea.vmem %s746_s0, %s723_s30 }
  0x11   : > { %636 = vset.pattern.permute.xlu1 %v662_v1  ;;  %637 = vset.pattern.permute.xlu0 %v662_v1  ;;  %v342_v12 = vld [vmem:[%s324_s29] sm:$0xff]  ;;  %s314_s11 = scalar_lea.vmem %s747_s1, %s723_s30  ;;  %v337_v48 = vld [vmem:[%s304_s8 + $0x8] sm:$0xff]  ;;  %s334_s14 = scalar_lea.vmem %s751_s5, %s723_s30 }
  0x12   : > { %453 = vperm.xlu1 %636, %v344_v5   ;;  %v354_v17 = vrot.slane %v342_v12, %v353_v8  ;;  %v358_v18 = vrot.slane %v342_v12, %v357_v9  ;;  %v380_v19 = vrot.slane %v342_v12, %v379_v10  ;;  %v384_v20 = vrot.slane %v342_v12, %v383_v11  ;;  %v336_v47 = vld [vmem:[%s304_s8] sm:$0xff]  ;;  %v339_v50 = vld [vmem:[%s314_s11 + $0x8] sm:$0xff] }
  0x13   : > { %v406_v21 = vrot.slane %v342_v12, %v405_v13  ;;  %v410_v22 = vrot.slane %v342_v12, %v409_v14  ;;  %v432_v25 = vrot.slane %v342_v12, %v431_v15  ;;  %v436_v26 = vrot.slane %v342_v12, %v435_v16  ;;  %v338_v49 = vld [vmem:[%s314_s11] sm:$0xff] }
  0x14   : > { %v364_v27 = vrot.slane %v354_v17, %v353_v8  ;;  %v368_v28 = vrot.slane %v358_v18, %v353_v8  ;;  %v390_v29 = vrot.slane %v380_v19, %v379_v10  ;;  %v394_v30 = vrot.slane %v384_v20, %v379_v10 }
  0x15   : > { %v416_v31 = vrot.slane %v406_v21, %v405_v13  ;;  %v420_v32 = vrot.slane %v410_v22, %v405_v13  ;;  %v442_v33 = vrot.slane %v432_v25, %v431_v15  ;;  %v446_v34 = vrot.slane %v436_v26, %v431_v15 }
  0x16   : > { %v340_v54 = vadd.f32 %v338_v49, %v336_v47  ;;  %v341_v55 = vadd.f32 %v339_v50, %v337_v48 }
  0x87   : > { %v348_v23 = vpop.permute.xlu0 %347  ;;  %v401_v24 = vpop.permute.xlu1 %400 }
  0x88   : > { %v369_v37 = vmul.f32 %v364_v27, %v348_v23  ;;  %v370_v38 = vmul.f32 %v368_v28, %v348_v23  ;;  %v421_v41 = vmul.f32 %v416_v31, %v401_v24  ;;  %v422_v42 = vmul.f32 %v420_v32, %v401_v24 }
  0x8c   : > { %v375_v35 = vpop.permute.xlu0 %374  ;;  %v427_v36 = vpop.permute.xlu1 %426 }
  0x8d   : > { %v395_v39 = vmul.f32 %v390_v29, %v375_v35  ;;  %v396_v40 = vmul.f32 %v394_v30, %v375_v35  ;;  %v447_v45 = vmul.f32 %v442_v33, %v427_v36  ;;  %v448_v46 = vmul.f32 %v446_v34, %v427_v36 }
  0x8f   : > { %v397_v43 = vadd.f32 %v395_v39, %v369_v37  ;;  %v398_v44 = vadd.f32 %v396_v40, %v370_v38 }
  0x91   : > { %v423_v51 = vadd.f32 %v421_v41, %v397_v43  ;;  %v424_v52 = vadd.f32 %v422_v42, %v398_v44  ;;  %v454_v53 = vpop.permute.xlu1 %453 }
  0x93   : > { %v449_v56 = vadd.f32 %v447_v45, %v423_v51  ;;  %v450_v57 = vadd.f32 %v448_v46, %v424_v52 }
  0x95   : > { %v456_v58 = vadd.f32 %v454_v53, %v449_v56  ;;  %v457_v59 = vadd.f32 %v454_v53, %v450_v57 }
  0x97   : > { %v458_v60 = vadd.f32 %v456_v58, %v340_v54  ;;  %v459_v61 = vadd.f32 %v457_v59, %v341_v55 }
  0x99   : > { %460 = vst [vmem:[%s334_s14] sm:$0xff] %v458_v60  ;;  %461 = vst [vmem:[%s334_s14 + $0x8] sm:$0xff] %v459_v61 }
  0x9a PF: > { %s15_s20 = sadd.s32 1, %s660_s20   ;;  %s752_s18 = smov %s656_s19 }
  0x9b   : > { %p12_p5 = scmp.ge.s32.totalorder %s15_s20, 4   ;;  %s753_s19 = smov %s755_s21 }
  0x9d   :  { %14 = sbr.rel (!%p12_p5) target bundleno = 2 (0x2), region = 76 }

// kernel: _lambda_.8
= control target key start
LH: loop header
LB: loop body
LE: loop exit
PB: predicated region body
PF: predicated region fallthrough
CT: control target
= control target key end

     0   :  { %s578_s18 = smov 0   ;;  %s685_s0 = inlined_call_operand.vmem [shape: f32[2,8,32], index: 0, kind: input, shape index: {}]   ;;  %s686_s1 = inlined_call_operand.vmem [shape: f32[2,8,32], index: 1, kind: input, shape index: {}]   ;;  %s687_s2 = inlined_call_operand.vmem [shape: f32[8,8,32], index: 2, kind: input, shape index: {}]   ;;  %s688_s3 = inlined_call_operand.vmem [shape: f32[8,8,32], index: 3, kind: input, shape index: {}]   ;;  %s689_s4 = inlined_call_operand.vmem [shape: f32[2,8,32], index: 4, kind: output, shape index: {0}]   ;;  %s690_s5 = inlined_call_operand.vmem [shape: f32[2,8,32], index: 5, kind: output, shape index: {1}]  }
   0x1 LB: > { %s507_s19 = sadd.s32 4294967295, %s546_s18   ;;  %p511_p0 = scmp.ge.s32.totalorder %s546_s18, 1  ;;  %s546_s18 = sphi %s578_s18, %s16_s18  }
   0x2   : > { %p198_p1 = scmp.lt.s32.totalorder %s546_s18, 3 }
   0x4   : > { %p199_p2 = pnand %p511_p0, %p198_p1 }
   0x5   : > { %p232_p3 = scmp.lt.s32.totalorder (!%p199_p2), %s507_s19, 1  ;;  %v252_v0 = vlaneseq (!%p199_p2)  ;;  %v250_v5 = vld [vmem:[%s687_s2] sm:$0xff] (!%p199_p2)  ;;  %v516_v11 = vld [vmem:[%s687_s2 + $0x8] sm:$0xff] (!%p199_p2)  ;;  %v518_v22 = vld [vmem:[%s687_s2 + $0x10] sm:$0xff] (!%p199_p2)  ;;  %vm408_vm0 = vcmask (!%p199_p2), 261120  }
   0x6   : > { %202 = sbr.rel (%p199_p2) target bundleno = 53 (0x35), region = 36  ;;  %v251_v8 = vld [vmem:[%s688_s3] sm:$0xff] (!%p199_p2)  ;;  %v517_v20 = vld [vmem:[%s688_s3 + $0x8] sm:$0xff] (!%p199_p2)  ;;  %v519_v33 = vld [vmem:[%s688_s3 + $0x10] sm:$0xff] (!%p199_p2) }
   0x7   : > { %v586_v1 = vshrl.u32 (!%p199_p2), %v252_v0, 7  ;;  %v520_v34 = vld [vmem:[%s687_s2 + $0x18] sm:$0xff] (!%p199_p2)  ;;  %v522_v45 = vld [vmem:[%s687_s2 + $0x20] sm:$0xff] (!%p199_p2)  ;;  %v524_v58 = vld [vmem:[%s687_s2 + $0x28] sm:$0xff] (!%p199_p2) }
   0x8   : > { %v521_v41 = vld [vmem:[%s688_s3 + $0x18] sm:$0xff] (!%p199_p2)  ;;  %v523_v54 = vld [vmem:[%s688_s3 + $0x20] sm:$0xff] (!%p199_p2) }
   0x9   : > { %v254_v2 = vsub.s32 (!%p199_p2), 0, %v586_v1  ;;  %v274_v3 = vsub.s32 (!%p199_p2), 1, %v586_v1  ;;  %v294_v4 = vsub.s32 (!%p199_p2), 2, %v586_v1  ;;  %v314_v15 = vsub.s32 (!%p199_p2), 3, %v586_v1 }
   0xa   : > { %v334_v31 = vsub.s32 (!%p199_p2), 4, %v586_v1  ;;  %v354_v38 = vsub.s32 (!%p199_p2), 5, %v586_v1  ;;  %v374_v57 = vsub.s32 (!%p199_p2), 6, %v586_v1 }
   0xd   : > { %s692_s19 = smov (!%p232_p3, %s507_s19), 1 }
   0xe   : > { %s588_s20 = sshll.u32 %s692_s19, 3 }
   0xf   : > { %s235_s23 = scalar_lea.vmem %s685_s0, %s588_s20  ;;  %s239_s26 = scalar_lea.vmem %s686_s1, %s588_s20 }
  0x10   : > { %v604_v6 = vld [vmem:[%s235_s23] sm:$0xff]  ;;  %s243_s13 = scalar_lea.vmem %s689_s4, %s588_s20  ;;  %s247_s16 = scalar_lea.vmem %s690_s5, %s588_s20 }
  0x11   : > { %v606_v7 = vld [vmem:[%s239_s26] sm:$0xff]  ;;  %v255_v9 = vrot.slane %v604_v6, %v254_v2  ;;  %v275_v12 = vrot.slane %v604_v6, %v274_v3  ;;  %v295_v14 = vrot.slane %v604_v6, %v294_v4  ;;  %v315_v30 = vrot.slane %v604_v6, %v314_v15 }
  0x12   : > { %v261_v10 = vrot.slane %v606_v7, %v254_v2  ;;  %v281_v13 = vrot.slane %v606_v7, %v274_v3  ;;  %v301_v25 = vrot.slane %v606_v7, %v294_v4  ;;  %v321_v37 = vrot.slane %v606_v7, %v314_v15  ;;  %v525_v4 = vld [vmem:[%s688_s3 + $0x28] sm:$0xff] }
  0x13   : > { %v256_v16 = vmul.f32 %v255_v9, %v250_v5  ;;  %v264_v18 = vmul.f32 %v255_v9, %v251_v8  ;;  %v276_v21 = vmul.f32 %v516_v11, %v275_v12  ;;  %v284_v27 = vmul.f32 %v517_v20, %v275_v12 }
  0x14   : > { %v262_v17 = vmul.f32 %v261_v10, %v251_v8  ;;  %v266_v19 = vmul.f32 %v261_v10, %v250_v5  ;;  %v282_v24 = vmul.f32 %v517_v20, %v281_v13  ;;  %v296_v29 = vmul.f32 %v518_v22, %v295_v14  ;;  %v526_v10 = vld [vmem:[%s687_s2 + $0x30] sm:$0xff] }
  0x15   : > { %v286_v32 = vmul.f32 %v516_v11, %v281_v13  ;;  %v302_v36 = vmul.f32 %v519_v33, %v301_v25  ;;  %v316_v42 = vmul.f32 %v520_v34, %v315_v30  ;;  %v335_v43 = vrot.slane %v604_v6, %v334_v31 }
  0x16   : > { %v263_v23 = vsub.f32 %v256_v16, %v262_v17  ;;  %v267_v26 = vadd.f32 %v266_v19, %v264_v18  ;;  %v304_v44 = vmul.f32 %v519_v33, %v295_v14  ;;  %v306_v47 = vmul.f32 %v518_v22, %v301_v25  ;;  %v527_v19 = vld [vmem:[%s688_s3 + $0x30] sm:$0xff] }
  0x17   : > { %v322_v49 = vmul.f32 %v521_v41, %v321_v37  ;;  %v341_v50 = vrot.slane %v606_v7, %v334_v31  ;;  %v324_v52 = vmul.f32 %v521_v41, %v315_v30  ;;  %v336_v55 = vmul.f32 %v522_v45, %v335_v43  ;;  %v529_v30 = vld [vmem:[%s688_s3 + $0x38] sm:$0xff] }
  0x18   : > { %v277_v28 = vadd.f32 %v276_v21, %v263_v23  ;;  %v285_v39 = vadd.f32 %v284_v27, %v267_v26  ;;  %v355_v56 = vrot.slane %v604_v6, %v354_v38  ;;  %v326_v60 = vmul.f32 %v520_v34, %v321_v37  ;;  %v528_v21 = vld [vmem:[%s687_s2 + $0x38] sm:$0xff] }
  0x19   : > { %v342_v62 = vmul.f32 %v523_v54, %v341_v50  ;;  %v361_v63 = vrot.slane %v606_v7, %v354_v38  ;;  %v344_v2 = vmul.f32 %v523_v54, %v335_v43  ;;  %v375_v8 = vrot.slane %v604_v6, %v374_v57 }
  0x1a   : > { %v283_v35 = vsub.f32 %v277_v28, %v282_v24  ;;  %v287_v46 = vadd.f32 %v286_v32, %v285_v39  ;;  %v356_v5 = vmul.f32 %v524_v58, %v355_v56  ;;  %v394_v9 = vsub.s32 7, %v586_v1 }
  0x1b   : > { %v346_v12 = vmul.f32 %v522_v45, %v341_v50  ;;  %v362_v14 = vmul.f32 %v525_v4, %v361_v63  ;;  %v381_v15 = vrot.slane %v606_v7, %v374_v57  ;;  %v364_v17 = vmul.f32 %v525_v4, %v355_v56 }
  0x1c   : > { %v297_v40 = vadd.f32 %v296_v29, %v283_v35  ;;  %v305_v51 = vadd.f32 %v304_v44, %v287_v46  ;;  %v376_v20 = vmul.f32 %v526_v10, %v375_v8  ;;  %v395_v1 = vrot.slane %v604_v6, %v394_v9 }
  0x1d   : > { %v366_v23 = vmul.f32 %v524_v58, %v361_v63  ;;  %v382_v25 = vmul.f32 %v527_v19, %v381_v15  ;;  %v401_v26 = vrot.slane %v606_v7, %v394_v9  ;;  %v384_v28 = vmul.f32 %v527_v19, %v375_v8 }
  0x1e   : > { %v303_v48 = vsub.f32 %v297_v40, %v302_v36  ;;  %v307_v59 = vadd.f32 %v306_v47, %v305_v51  ;;  %v396_v6 = vmul.f32 %v528_v21, %v395_v1  ;;  %v386_v32 = vmul.f32 %v526_v10, %v381_v15 }
  0x1f   : > { %v402_v34 = vmul.f32 %v529_v30, %v401_v26  ;;  %v404_v36 = vmul.f32 %v529_v30, %v395_v1  ;;  %v406_v38 = vmul.f32 %v528_v21, %v401_v26 }
  0x20   : > { %v317_v53 = vadd.f32 %v316_v42, %v303_v48  ;;  %v325_v0 = vadd.f32 %v324_v52, %v307_v59 }
  0x22   : > { %v323_v61 = vsub.f32 %v317_v53, %v322_v49  ;;  %v327_v11 = vadd.f32 %v326_v60, %v325_v0 }
  0x24   : > { %v337_v3 = vadd.f32 %v336_v55, %v323_v61  ;;  %v345_v16 = vadd.f32 %v344_v2, %v327_v11 }
  0x26   : > { %v343_v13 = vsub.f32 %v337_v3, %v342_v62  ;;  %v347_v22 = vadd.f32 %v346_v12, %v345_v16 }
  0x28   : > { %v357_v18 = vadd.f32 %v356_v5, %v343_v13  ;;  %v365_v27 = vadd.f32 %v364_v17, %v347_v22 }
  0x2a   : > { %v363_v24 = vsub.f32 %v357_v18, %v362_v14  ;;  %v367_v31 = vadd.f32 %v366_v23, %v365_v27 }
  0x2c   : > { %v377_v29 = vadd.f32 %v376_v20, %v363_v24  ;;  %v385_v35 = vadd.f32 %v384_v28, %v367_v31 }
  0x2e   : > { %v383_v33 = vsub.f32 %v377_v29, %v382_v25  ;;  %v387_v7 = vadd.f32 %v386_v32, %v385_v35 }
  0x30   : > { %v397_v37 = vadd.f32 %v396_v6, %v383_v33  ;;  %v405_v40 = vadd.f32 %v404_v36, %v387_v7 }
  0x32   : > { %v403_v39 = vsub.f32 %v397_v37, %v402_v34  ;;  %v407_v41 = vadd.f32 %v406_v38, %v405_v40 }
  0x34   : > { %409 = vst.msk [vmem:[%s243_s13] sm:$0xff] %vm408_vm0, %v403_v39  ;;  %410 = vst.msk [vmem:[%s247_s16] sm:$0xff] %vm408_vm0, %v407_v41 }
  0x35 PF: > { %s16_s18 = sadd.s32 1, %s546_s18  }
  0x36   : > { %p13_p4 = scmp.ge.s32.totalorder %s16_s18, 4  }
  0x38   :  { %15 = sbr.rel (!%p13_p4) target bundleno = 1 (0x1), region = 95 }

</bundles_post_ra>
